<compile_context>
chip_gen: v7x
topology: tpu7x:2x2x1
jax: 0.10.0
libtpu: 0.0.40
codegen_flags: <defaults>
</compile_context>

<pallas_src>
import math
import functools

import jax
import jax.numpy as jnp
from jax.experimental import pallas as pl
from jax.experimental.pallas import tpu as pltpu


_TARGET_BLOCK_BYTES = 2 * 1024 * 1024   # ~2 MiB output blocks (x2 pipeline buffers)
_VMEM_LIMIT_BYTES = 32 * 1024 * 1024    # <= default scoped limit on v5e/v6e/v7x


def _round_up(x, m):
    return -(-x // m) * m


def _rel_pos_sinusoid_kernel(tab_ref, o_ref, *, max_rel, n_keys):
    """Writes one (TQ, TKD) lane-dense tile of the flattened (qlen, klen*d)
    relative-position sinusoid table (flat column index = key*d + channel).

    tab_ref: (3, TKD) VMEM table, identical for every tile (fetched once):
        row 0: inv_freq[channel]   (d-periodic over lanes)
        row 1: phase[channel]      (0 for sin lanes, pi/2 for cos lanes)
        row 2: key offset within the tile, as float (0,0,...,1,1,...)
    """
    TQ, TKD = o_ref.shape
    q0 = pl.program_id(0) * TQ            # first query row of this tile
    k_first = pl.program_id(1) * n_keys   # first key column of this tile

    inv_freq = tab_ref[0:1, :]            # (1, TKD)
    phase = tab_ref[1:2, :]               # (1, TKD)
    k_local = tab_ref[2:3, :]             # (1, TKD)

    two_m = jnp.float32(2 * max_rel)

    # ---- constant-tile fast path -------------------------------------------
    # If every (i, j) in the tile has j - i >= max_rel (or <= -max_rel), the
    # clipped position is a single constant, so the whole tile is one
    # d-periodic row: one (1, TKD) sin, then a broadcast store.
    all_hi = (k_first - (q0 + TQ - 1)) >= max_rel        # dist >= +M everywhere
    all_lo = ((k_first + n_keys - 1) - q0) <= -max_rel   # dist <= -M everywhere
    is_const = jnp.logical_or(all_hi, all_lo)

    @pl.when(is_const)
    def _():
        pos_c = jnp.where(all_hi, two_m, jnp.float32(0.0))
        row = jnp.sin(pos_c * inv_freq + phase)                      # (1, TKD)
        o_ref[...] = jnp.broadcast_to(row, (TQ, TKD)).astype(o_ref.dtype)

    # ---- general path --------------------------------------------------------
    @pl.when(jnp.logical_not(is_const))
    def _():
        # Absolute key index + max_rel per lane (hoisted to one (1, TKD) op).
        k_row = k_local + (k_first + max_rel).astype(jnp.float32)
        # Absolute query index per sublane row.
        qi = (q0 + jax.lax.broadcasted_iota(jnp.int32, (TQ, 1), 0)
              ).astype(jnp.float32)
        # clip(j - i, -M, M) + M  ==  clamp((j + M) - i, 0, 2M); exact in f32.
        pos = jnp.clip(k_row - qi, 0.0, two_m)                       # (TQ, TKD)
        # One VPU mul + add and a single transcendental per element.
        o_ref[...] = jnp.sin(pos * inv_freq + phase).astype(o_ref.dtype)


def _pick_tiles(qlen, klen, d, block_q=None, block_k=None):
    """Choose (tq, tkd): tq query rows x tkd flattened (key*d) lanes per block.
    tkd is a multiple of both 128 and d (or the full klen*d row) and tq is a
    multiple of 8 (or the full qlen), so the (8,128) BlockSpec rule always
    holds and stores are unmasked full-width vst."""
    flat = klen * d
    lane_unit = (128 * d) // math.gcd(128, d)            # lcm(128, d)

    if block_k is not None:
        tkd = min(flat, _round_up(max(1, block_k) * d, lane_unit))
    elif flat * 4 * 8 <= _TARGET_BLOCK_BYTES or flat <= lane_unit:
        tkd = flat                                        # full rows: one burst / query
    else:
        tkd = min(flat, _round_up(_TARGET_BLOCK_BYTES // (8 * 4), lane_unit))

    if block_q is not None:
        tq_req = max(1, block_q)
    else:
        tq_req = max(1, _TARGET_BLOCK_BYTES // (tkd * 4))
    tq = qlen if tq_req >= qlen else min(qlen, _round_up(tq_req, 8))
    return int(tq), int(tkd)


def _build_position_embeddings(qlen, klen, d, max_rel,
                               block_q=None, block_k=None, dtype=jnp.float32):
    flat = klen * d
    tq, tkd = _pick_tiles(qlen, klen, d, block_q, block_k)
    n_keys = tkd // d
    grid = (pl.cdiv(qlen, tq), pl.cdiv(flat, tkd))

    # Tiny d-periodic per-lane table, identical for every tile (constant input
    # index_map -> fetched once, stays resident in VMEM).
    lane = jnp.arange(tkd, dtype=jnp.int32)
    chan = lane % d
    inv_freq = jnp.exp((chan - (chan % 2)).astype(jnp.float32)
                       * jnp.float32(-math.log(10000.0) / d))
    phase = (chan % 2).astype(jnp.float32) * jnp.float32(math.pi / 2.0)
    k_local = (lane // d).astype(jnp.float32)
    tab = jnp.stack([inv_freq, phase, k_local], axis=0)              # (3, tkd)

    kern = functools.partial(_rel_pos_sinusoid_kernel,
                             max_rel=max_rel, n_keys=n_keys)

    def run(dim_sems):
        out = pl.pallas_call(
            kern,
            out_shape=jax.ShapeDtypeStruct((qlen, flat), dtype),
            grid=grid,
            in_specs=[pl.BlockSpec((3, tkd), lambda i, j: (0, 0))],
            out_specs=pl.BlockSpec((tq, tkd), lambda i, j: (i, j)),
            compiler_params=pltpu.CompilerParams(
                dimension_semantics=dim_sems,
                vmem_limit_bytes=_VMEM_LIMIT_BYTES,
            ),
        )(tab)
        return jax.block_until_ready(out)

    try:
        # v7x: shard query-row blocks across both TensorCores.
        out = run((pltpu.CORE_PARALLEL, pltpu.ARBITRARY))
    except Exception:
        # 1-TC chips / runtimes that reject CORE_PARALLEL for this grid.
        out = run(("parallel", "parallel"))
    # Free reshape of the contiguous row-major slab back to (qlen, klen, d).
    return out.reshape(qlen, klen, d)


class RelativePositionsEncoding:
    """JAX/Pallas port of the PyTorch module: the (qlen, klen, d) buffer is
    built once in __init__ by the Pallas kernel; forward() is a slice."""

    def __init__(self, qlen, klen, embedding_size, max_relative_position=127,
                 block_q=None, block_k=None, dtype=jnp.float32):
        assert embedding_size % 2 == 0, "embedding_size must be even (as in torch)"
        # dtype=jnp.bfloat16 halves HBM write traffic (values in [-1,1], ~4e-3
        # abs error); keep f32 default to match the torch buffer exactly.
        self.position_embeddings = _build_position_embeddings(
            qlen, klen, embedding_size, max_relative_position,
            block_q=block_q, block_k=block_k, dtype=dtype)

    def __call__(self, qlen, klen):
        # forward(): slice of the registered buffer (plain JAX glue).
        return self.position_embeddings[:qlen, :klen, :]


def _reference(qlen, klen, d, max_rel):
    """Pure-JAX reference mirroring the PyTorch implementation (table + gather)."""
    vocab = 2 * max_rel + 1
    position = jnp.arange(vocab, dtype=jnp.float32)[:, None]
    div_term = jnp.exp(jnp.arange(0, d, 2, dtype=jnp.float32)
                       * (-math.log(10000.0) / d))
    table = jnp.zeros((vocab, d), jnp.float32)
    table = table.at[:, 0::2].set(jnp.sin(position * div_term))
    table = table.at[:, 1::2].set(jnp.cos(position * div_term))
    dist = (jnp.arange(klen, dtype=jnp.int32)[None, :]
            - jnp.arange(qlen, dtype=jnp.int32)[:, None])
    idx = jnp.clip(dist, -max_rel, max_rel) + max_rel
    return table[idx]


if __name__ == "__main__":
    key = jax.random.PRNGKey(0)   # module has no learned params; kept for convention
    del key

    qlen, klen, d = 16, 64, 32

    # Case 1: small max_relative_position + explicit small blocks -> a real
    # 2x2 grid where the two right-hand tiles take the constant-tile fast path.
    max_rel = 16
    mod = RelativePositionsEncoding(qlen, klen, d, max_relative_position=max_rel,
                                    block_q=8, block_k=32)
    out = jax.block_until_ready(mod(8, 48))          # forward(qlen=8, klen=48)
    ref = _reference(qlen, klen, d, max_rel)[:8, :48, :]
    assert out.shape == (8, 48, d) and out.dtype == jnp.float32
    err = float(jnp.max(jnp.abs(out - ref)))
    assert err < 2e-3, err

    # Case 2: default max_relative_position (127), auto-chosen tiles
    # (full lane-dense rows, single block).
    mod2 = RelativePositionsEncoding(qlen, klen, d)
    out2 = jax.block_until_ready(mod2(qlen, klen))
    ref2 = _reference(qlen, klen, d, 127)
    assert out2.shape == (qlen, klen, d)
    err2 = float(jnp.max(jnp.abs(out2 - ref2)))
    assert err2 < 2e-3, err2

    print("KERNEL_OK")
</pallas_src>

<mosaic_0001>
module attributes {stable_mosaic.version = 11 : i64} {
  func.func @_rel_pos_sinusoid_kernel(%arg0: i32, %arg1: i32, %arg2: memref<3x1024xf32, #tpu.memory_space<vmem>>, %arg3: memref<8x1024xf32, #tpu.memory_space<vmem>>) attributes {dimension_semantics = [#tpu.dimension_semantics<core_parallel>, #tpu.dimension_semantics<arbitrary>], iteration_bounds = array<i64: 2, 2>, scalar_prefetch = 0 : i64, scratch_operands = 0 : i64, tpu.core_type = #tpu.core_type<tc>, window_params = [{pipeline_mode = #tpu.pipeline_mode<synchronous>, transform_indices = @transform_0, window_bounds = array<i64: 3, 1024>}, {transform_indices = @transform_1, window_bounds = array<i64: 8, 1024>}]} {
    %c8_i32 = arith.constant 8 : i32
    %0 = arith.muli %arg0, %c8_i32 : i32
    %c32_i32 = arith.constant 32 : i32
    %1 = arith.muli %arg1, %c32_i32 : i32
    %c0 = arith.constant 0 : index
    %c0_0 = arith.constant 0 : index
    %2 = vector.load %arg2[%c0, %c0_0] : memref<3x1024xf32, #tpu.memory_space<vmem>>, vector<1x1024xf32>
    %c1 = arith.constant 1 : index
    %c0_1 = arith.constant 0 : index
    %3 = vector.load %arg2[%c1, %c0_1] : memref<3x1024xf32, #tpu.memory_space<vmem>>, vector<1x1024xf32>
    %c2 = arith.constant 2 : index
    %c0_2 = arith.constant 0 : index
    %4 = vector.load %arg2[%c2, %c0_2] : memref<3x1024xf32, #tpu.memory_space<vmem>>, vector<1x1024xf32>
    %c8_i32_3 = arith.constant 8 : i32
    %5 = arith.addi %0, %c8_i32_3 : i32
    %c1_i32 = arith.constant 1 : i32
    %6 = arith.subi %5, %c1_i32 : i32
    %7 = arith.subi %1, %6 : i32
    %c16_i32 = arith.constant 16 : i32
    %8 = arith.cmpi sge, %7, %c16_i32 : i32
    %c32_i32_4 = arith.constant 32 : i32
    %9 = arith.addi %1, %c32_i32_4 : i32
    %c1_i32_5 = arith.constant 1 : i32
    %10 = arith.subi %9, %c1_i32_5 : i32
    %11 = arith.subi %10, %0 : i32
    %c-16_i32 = arith.constant -16 : i32
    %12 = arith.cmpi sle, %11, %c-16_i32 : i32
    %13 = arith.ori %8, %12 : i1
    %14 = arith.extui %13 : i1 to i32
    %cst = arith.constant 3.200000e+01 : f32
    %c0_i32 = arith.constant 0 : i32
    %15 = arith.cmpi ne, %14, %c0_i32 : i32
    scf.if %15 {
      %cst_8 = arith.constant 0.000000e+00 : f32
      %19 = arith.select %8, %cst, %cst_8 : f32
      %20 = vector.broadcast %19 : f32 to vector<1x1024xf32>
      %21 = arith.mulf %20, %2 : vector<1x1024xf32>
      %22 = arith.addf %21, %3 : vector<1x1024xf32>
      %23 = math.sin %22 : vector<1x1024xf32>
      %24 = vector.shape_cast %23 : vector<1x1024xf32> to vector<1x1024xf32>
      %25 = vector.broadcast %24 : vector<1x1024xf32> to vector<8x1024xf32>
      %c0_9 = arith.constant 0 : index
      %c0_10 = arith.constant 0 : index
      %26 = vector.load %arg3[%c0_9, %c0_10] : memref<8x1024xf32, #tpu.memory_space<vmem>>, vector<8x1024xf32>
      tpu.vector_store %arg3[%c0_9, %c0_10], %25 {strides = array<i32>} : memref<8x1024xf32, #tpu.memory_space<vmem>>, vector<8x1024xf32>,
    } else {
    }
    %true = arith.constant true
    %16 = arith.xori %13, %true : i1
    %17 = arith.extui %16 : i1 to i32
    %cst_6 = arith.constant 3.200000e+01 : f32
    %c0_i32_7 = arith.constant 0 : i32
    %18 = arith.cmpi ne, %17, %c0_i32_7 : i32
    scf.if %18 {
      %c16_i32_8 = arith.constant 16 : i32
      %19 = arith.addi %1, %c16_i32_8 : i32
      %20 = arith.sitofp %19 : i32 to f32
      %21 = vector.broadcast %20 : f32 to vector<1x1024xf32>
      %22 = arith.addf %4, %21 : vector<1x1024xf32>
      %23 = tpu.iota {dimensions = array<i32: 0>} : vector<8x1xi32>
      %24 = vector.broadcast %0 : i32 to vector<8x1xi32>
      %25 = arith.addi %24, %23 : vector<8x1xi32>
      %26 = arith.sitofp %25 : vector<8x1xi32> to vector<8x1xf32>
      %27 = vector.broadcast %22 : vector<1x1024xf32> to vector<8x1024xf32>
      %28 = vector.broadcast %26 : vector<8x1xf32> to vector<8x1024xf32>
      %29 = arith.subf %27, %28 : vector<8x1024xf32>
      %cst_9 = arith.constant 0.000000e+00 : f32
      %30 = vector.broadcast %cst_9 : f32 to vector<8x1024xf32>
      %31 = arith.maximumf %30, %29 : vector<8x1024xf32>
      %32 = vector.broadcast %cst_6 : f32 to vector<8x1024xf32>
      %33 = arith.minimumf %32, %31 : vector<8x1024xf32>
      %34 = vector.broadcast %2 : vector<1x1024xf32> to vector<8x1024xf32>
      %35 = arith.mulf %33, %34 : vector<8x1024xf32>
      %36 = vector.broadcast %3 : vector<1x1024xf32> to vector<8x1024xf32>
      %37 = arith.addf %35, %36 : vector<8x1024xf32>
      %38 = math.sin %37 : vector<8x1024xf32>
      %c0_10 = arith.constant 0 : index
      %c0_11 = arith.constant 0 : index
      %39 = vector.load %arg3[%c0_10, %c0_11] : memref<8x1024xf32, #tpu.memory_space<vmem>>, vector<8x1024xf32>
      tpu.vector_store %arg3[%c0_10, %c0_11], %38 {strides = array<i32>} : memref<8x1024xf32, #tpu.memory_space<vmem>>, vector<8x1024xf32>,
    } else {
    }
    return
  }
  func.func @transform_0(%arg0: i32, %arg1: i32) -> (i32, i32) {
    %c0_i32 = arith.constant 0 : i32
    %c0_i32_0 = arith.constant 0 : i32
    %c0_i32_1 = arith.constant 0 : i32
    return %c0_i32, %c0_i32_0 : i32, i32
  }
  func.func @transform_1(%arg0: i32, %arg1: i32) -> (i32, i32) {
    %c0_i32 = arith.constant 0 : i32
    return %arg0, %arg1 : i32, i32
  }
}

module attributes {stable_mosaic.version = 11 : i64} {
  func.func @_rel_pos_sinusoid_kernel(%arg0: i32, %arg1: i32, %arg2: memref<3x1024xf32, #tpu.memory_space<vmem>>, %arg3: memref<8x1024xf32, #tpu.memory_space<vmem>>) attributes {dimension_semantics = [#tpu.dimension_semantics<parallel>, #tpu.dimension_semantics<parallel>], iteration_bounds = array<i64: 2, 2>, scalar_prefetch = 0 : i64, scratch_operands = 0 : i64, tpu.core_type = #tpu.core_type<tc>, window_params = [{pipeline_mode = #tpu.pipeline_mode<synchronous>, transform_indices = @transform_0, window_bounds = array<i64: 3, 1024>}, {transform_indices = @transform_1, window_bounds = array<i64: 8, 1024>}]} {
    %c8_i32 = arith.constant 8 : i32
    %0 = arith.muli %arg0, %c8_i32 : i32
    %c32_i32 = arith.constant 32 : i32
    %1 = arith.muli %arg1, %c32_i32 : i32
    %c0 = arith.constant 0 : index
    %c0_0 = arith.constant 0 : index
    %2 = vector.load %arg2[%c0, %c0_0] : memref<3x1024xf32, #tpu.memory_space<vmem>>, vector<1x1024xf32>
    %c1 = arith.constant 1 : index
    %c0_1 = arith.constant 0 : index
    %3 = vector.load %arg2[%c1, %c0_1] : memref<3x1024xf32, #tpu.memory_space<vmem>>, vector<1x1024xf32>
    %c2 = arith.constant 2 : index
    %c0_2 = arith.constant 0 : index
    %4 = vector.load %arg2[%c2, %c0_2] : memref<3x1024xf32, #tpu.memory_space<vmem>>, vector<1x1024xf32>
    %c8_i32_3 = arith.constant 8 : i32
    %5 = arith.addi %0, %c8_i32_3 : i32
    %c1_i32 = arith.constant 1 : i32
    %6 = arith.subi %5, %c1_i32 : i32
    %7 = arith.subi %1, %6 : i32
    %c16_i32 = arith.constant 16 : i32
    %8 = arith.cmpi sge, %7, %c16_i32 : i32
    %c32_i32_4 = arith.constant 32 : i32
    %9 = arith.addi %1, %c32_i32_4 : i32
    %c1_i32_5 = arith.constant 1 : i32
    %10 = arith.subi %9, %c1_i32_5 : i32
    %11 = arith.subi %10, %0 : i32
    %c-16_i32 = arith.constant -16 : i32
    %12 = arith.cmpi sle, %11, %c-16_i32 : i32
    %13 = arith.ori %8, %12 : i1
    %14 = arith.extui %13 : i1 to i32
    %cst = arith.constant 3.200000e+01 : f32
    %c0_i32 = arith.constant 0 : i32
    %15 = arith.cmpi ne, %14, %c0_i32 : i32
    scf.if %15 {
      %cst_8 = arith.constant 0.000000e+00 : f32
      %19 = arith.select %8, %cst, %cst_8 : f32
      %20 = vector.broadcast %19 : f32 to vector<1x1024xf32>
      %21 = arith.mulf %20, %2 : vector<1x1024xf32>
      %22 = arith.addf %21, %3 : vector<1x1024xf32>
      %23 = math.sin %22 : vector<1x1024xf32>
      %24 = vector.shape_cast %23 : vector<1x1024xf32> to vector<1x1024xf32>
      %25 = vector.broadcast %24 : vector<1x1024xf32> to vector<8x1024xf32>
      %c0_9 = arith.constant 0 : index
      %c0_10 = arith.constant 0 : index
      %26 = vector.load %arg3[%c0_9, %c0_10] : memref<8x1024xf32, #tpu.memory_space<vmem>>, vector<8x1024xf32>
      tpu.vector_store %arg3[%c0_9, %c0_10], %25 {strides = array<i32>} : memref<8x1024xf32, #tpu.memory_space<vmem>>, vector<8x1024xf32>,
    } else {
    }
    %true = arith.constant true
    %16 = arith.xori %13, %true : i1
    %17 = arith.extui %16 : i1 to i32
    %cst_6 = arith.constant 3.200000e+01 : f32
    %c0_i32_7 = arith.constant 0 : i32
    %18 = arith.cmpi ne, %17, %c0_i32_7 : i32
    scf.if %18 {
      %c16_i32_8 = arith.constant 16 : i32
      %19 = arith.addi %1, %c16_i32_8 : i32
      %20 = arith.sitofp %19 : i32 to f32
      %21 = vector.broadcast %20 : f32 to vector<1x1024xf32>
      %22 = arith.addf %4, %21 : vector<1x1024xf32>
      %23 = tpu.iota {dimensions = array<i32: 0>} : vector<8x1xi32>
      %24 = vector.broadcast %0 : i32 to vector<8x1xi32>
      %25 = arith.addi %24, %23 : vector<8x1xi32>
      %26 = arith.sitofp %25 : vector<8x1xi32> to vector<8x1xf32>
      %27 = vector.broadcast %22 : vector<1x1024xf32> to vector<8x1024xf32>
      %28 = vector.broadcast %26 : vector<8x1xf32> to vector<8x1024xf32>
      %29 = arith.subf %27, %28 : vector<8x1024xf32>
      %cst_9 = arith.constant 0.000000e+00 : f32
      %30 = vector.broadcast %cst_9 : f32 to vector<8x1024xf32>
      %31 = arith.maximumf %30, %29 : vector<8x1024xf32>
      %32 = vector.broadcast %cst_6 : f32 to vector<8x1024xf32>
      %33 = arith.minimumf %32, %31 : vector<8x1024xf32>
      %34 = vector.broadcast %2 : vector<1x1024xf32> to vector<8x1024xf32>
      %35 = arith.mulf %33, %34 : vector<8x1024xf32>
      %36 = vector.broadcast %3 : vector<1x1024xf32> to vector<8x1024xf32>
      %37 = arith.addf %35, %36 : vector<8x1024xf32>
      %38 = math.sin %37 : vector<8x1024xf32>
      %c0_10 = arith.constant 0 : index
      %c0_11 = arith.constant 0 : index
      %39 = vector.load %arg3[%c0_10, %c0_11] : memref<8x1024xf32, #tpu.memory_space<vmem>>, vector<8x1024xf32>
      tpu.vector_store %arg3[%c0_10, %c0_11], %38 {strides = array<i32>} : memref<8x1024xf32, #tpu.memory_space<vmem>>, vector<8x1024xf32>,
    } else {
    }
    return
  }
  func.func @transform_0(%arg0: i32, %arg1: i32) -> (i32, i32) {
    %c0_i32 = arith.constant 0 : i32
    %c0_i32_0 = arith.constant 0 : i32
    %c0_i32_1 = arith.constant 0 : i32
    return %c0_i32, %c0_i32_0 : i32, i32
  }
  func.func @transform_1(%arg0: i32, %arg1: i32) -> (i32, i32) {
    %c0_i32 = arith.constant 0 : i32
    return %arg0, %arg1 : i32, i32
  }
}

</mosaic_0001>

<bundles_post_ra>
// kernel: tpu_custom_call.1
= control target key start
LH: loop header
LB: loop body
LE: loop exit
PB: predicated region body
PF: predicated region fallthrough
CT: control target
= control target key end

     0   :  { %6 = vsyncpa [#allocation3], 0  ;;  %s2627_s0 = inlined_call_operand.hbm [shape: f32[3,1024], index: 0, kind: input, shape index: {}]   ;;  %s2628_s1 = inlined_call_operand.hbm [shape: f32[16,2048], index: 1, kind: output, shape index: {}]  }
   0x1   :  { %7 = vsyncpa [#allocation4], 0 }
   0x2   :  { %9 = vsyncpa [#allocation4 + $0x1], 0  ;;  %s1771_s6 = smov 0   ;;  %s1773_s7 = smov 0  }
   0x3   :  { %s1775_s8 = smov 0   ;;  %s1777_s9 = smov 0  }
   0x4   :  { %s1779_s10 = smov 0   ;;  %s1781_s11 = smov 0  }
   0x5   :  { %s1783_s12 = smov 0   ;;  %s1785_s13 = smov 0  }
   0x6 LB: > { %s1402_s14 = sadd.s32 4294967295, %s1745_s13   ;;  %s1403_s15 = sadd.s32 4294967294, %s1745_s13   ;;  %s1745_s13 = sphi %s1785_s13, %s15_s13   ;;  %s1741_s12 = sphi %s1783_s12, %s2661_s12   ;;  %s1737_s11 = sphi %s1781_s11, %s2660_s11   ;;  %s1733_s10 = sphi %s1779_s10, %s2659_s10   ;;  %s1729_s9 = sphi %s1777_s9, %s2658_s9   ;;  %s1725_s8 = sphi %s1775_s8, %s2657_s8   ;;  %s1721_s7 = sphi %s1773_s7, %s2656_s7   ;;  %s1717_s6 = sphi %s1771_s6, %s2655_s6  }
   0x7   : > { %s24_s16 = sadd.s32 1, %s1737_s11  ;;  %s27_s17 = sadd.s32 1, %s1741_s12 }
   0x8   : > { %p25_p0 = scmp.ge.s32.totalorder %s24_s16, 2  ;;  %s57_s18 = sadd.s32 1, %s1725_s8 }
   0x9   : > { %p67_p1 = scmp.ne.s32.totalorder %s1725_s8, %s1721_s7  ;;  %p68_p2 = scmp.eq.s32.totalorder %s1402_s14, 3 }
   0xa   : > { %s2663_s16 = smov (%p25_p0, %s24_s16), 0  ;;  %s2665_s17 = smov (!%p25_p0, %s27_s17), %s1741_s12 }
   0xb   : > { %s53_s19 = ssub.s32 %s1737_s11, %s2663_s16  ;;  %p1823_p3 = por %p68_p2, %p67_p1 }
   0xc   : > { %p29_p4 = scmp.ge.s32.totalorder %s2665_s17, 2  ;;  %p73_p5 = scmp.ne.s32.totalorder %s1721_s7, %s1717_s6 }
   0xd   : > { %s2633_s20 = scalar_select %p1823_p3, 1, 0 }
   0xe   : > { %p74_p6 = scmp.eq.s32.totalorder %s1403_s15, 3  ;;  %p1404_p7 = scmp.ge.s32.totalorder %s1745_s13, 1 }
   0xf   : > { %s2667_s17 = smov (%p29_p4, %s2665_s17), 0  ;;  %p81_p9 = scmp.lt.s32.totalorder %s1745_s13, 5 }
  0x10   : > { %p1832_p8 = por %p74_p6, %p73_p5  ;;  %s52_s22 = ssub.s32 %s1741_s12, %s2667_s17 }
  0x11   : > { %s54_s23 = sor.u32 %s53_s19, %s52_s22  ;;  %p1839_p10 = pnand %p1404_p7, %p81_p9 }
  0x12   : > { %s2634_s21 = scalar_select %p1832_p8, 1, 0 }
  0x13   : > { %s2635_s24 = scalar_select %p1839_p10, 1, 0 }
  0x14   : > { %p55_p11 = scmp.eq.s32.totalorder %s54_s23, 0  ;;  %p1843_p12 = scmp.eq.s32.totalorder %s1402_s14, 0 }
  0x15   : > { %p1495_p13 = pneg %p1839_p10  ;;  %s1747_s27 = smov [#allocation2]  }
  0x16   : > { %s2636_s25 = scalar_select %p1843_p12, 1, 0 }
  0x17   : > { %s1850_s26 = scalar_select %p55_p11, %s1725_s8, %s57_s18  }
  0x18   : > { %s94_s28 = sshll.u32 %s1747_s27, 4  ;;  %p1854_p0 = pnand %p1843_p12, %p1495_p13  ;;  %s95_s28 = int_to_ptr.vmem [resolvable:$true] %s94_s28 }
  0x19   : > { %s1619_s3 = scalar_lea.hbm %s2627_s0, 512 }
  0x1a   : > { %p1620_p1 = scmp.ne.s32.totalorder %s2627_s0, %s1619_s3  ;;  %p1621_p2 = pneg %p1854_p0 }
  0x1b   : > { %p1626_p6 = scmp.lt.u32.totalorder %s1619_s3, %s2627_s0 }
  0x1c   : > { %p1622_p4 = pnand %p1621_p2, %p1620_p1 }
  0x1e   : > { %p1623_p5 = pneg %p1622_p4 }
  0x20   : > { %p1628_p7 = pnand %p1626_p6, %p1623_p5 }
  0x22   : > { %1631 = shalt.err (!%p1628_p7)
}
  0x23   : > { %s1632_s18 = scalar_lea.vmem %s95_s28, 512  ;;  %p1640_p8 = scmp.lt.s32.totalorder %s95_s28, %s95_s28 }
  0x24   : > { %p1633_p9 = scmp.ne.s32.totalorder %s95_s28, %s1632_s18  ;;  %p1641_p3 = scmp.lt.s32.totalorder %s1632_s18, %s1632_s18 }
  0x26   : > { %p1635_p11 = pnand %p1633_p9, %p1621_p2  ;;  %p1642_p12 = por %p1641_p3, %p1640_p8 }
  0x28   : > { %p1636_p13 = pneg %p1635_p11 }
  0x2a   : > { %p1643_p10 = pnand %p1642_p12, %p1636_p13 }
  0x2c   : > { %1646 = shalt.err (!%p1643_p10)
}
  0x2d   : > { %1498 = dma.hbm_to_vmem [thread:$0]  (!%p1854_p0), %s2627_s0, 512, %s95_s28, [#allocation3]  }
  0x2e   : > { %p2638_p1 = scmp.ne.s32.totalorder %s2635_s24, 0 }
  0x2f   : > { %p2639_p4 = scmp.ne.s32.totalorder (!%p2638_p1), %s2636_s25, 0 }
  0x30   : > { %107 = sbr.rel (%p2638_p1) target bundleno = 447 (0x1bf), region = 24 }
  0x37   : > { %1708 = dma.done.wait (%p2639_p4), [#allocation3], 512  }
  0x38   : > { %1710 = vsyncadd (%p2639_p4), [#allocation3], 4294966784  ;;  %s119_s23 = sand.u32 1, %s1721_s7   ;;  %s1882_s27 = sshll.u32 %s1733_s10, 3  ;;  %v1893_v0 = vld [vmem:[#allocation2] ss:$4 sm:$0xff] }
  0x39   : > { %s1408_s28 = sshll.u32 %s119_s23, 6  ;;  %s1887_s29 = sshll.u32 %s1729_s9, 5  ;;  %v1895_v1 = vld [vmem:[#allocation2 + $0x1] ss:$4 sm:$0xff]  ;;  %v1897_v2 = vld [vmem:[#allocation2 + $0x2] ss:$4 sm:$0xff] }
  0x3a   : > { %s130_s24 = sadd.s32 7, %s1882_s27  ;;  %s133_s2 = sadd.s32 31, %s1887_s29 }
  0x3b   : > { %s131_s30 = ssub.s32 %s1887_s29, %s130_s24  ;;  %s134_s25 = ssub.s32 %s133_s2, %s1882_s27 }
  0x3c   : > { %p132_p3 = scmp.ge.s32.totalorder %s131_s30, 16  ;;  %p135_p8 = scmp.le.s32.totalorder %s134_s25, 4294967280 }
  0x3d   : > { %s1903_s4 = scalar_lea.vmem [#allocation5], %s1408_s28 }
  0x3e   : > { %p1899_p10 = por %p135_p8, %p132_p3 }
  0x3f   : > { %v1748_v17 = vmov (%p1899_p10), 683565275   ;;  %v1749_v19 = vmov (%p1899_p10), 2475754826   ;;  %v1750_v21 = vmov (%p1899_p10), 2131351028  }
  0x40   : > { %139 = sbr.rel (!%p1899_p10) target bundleno = 164 (0xa4), region = 32  ;;  %v1751_v23 = vmov (%p1899_p10), 2102212464   ;;  %v1752_v25 = vmov (%p1899_p10), 920167782  }
  0x41   : > { %v1753_v32 = vmov (%p1899_p10), 1326507024  }
  0x47   : > { %s140_s5 = scalar_select %p132_p3, 32.0, 0.0 }
  0x49   : > { %v141_v3 = vstv %s140_s5 }
  0x4a   : > { %v142_v4 = vmul.f32 %v141_v3, %v1893_v0 }
  0x4c   : > { %v1909_v5 = vadd.f32 %v142_v4, %v1895_v1 }
  0x4e   : > { %v147_v6 = vand.u32 2139095040, %v1909_v5  ;;  %v144_v8 = vand.u32 2147483647, %v1909_v5  ;;  %vm146_vm7 = vcmp.lt.s32.totalorder %v1909_v5, 0  ;;  %vm236_vm12 = vweird.f32 %v1909_v5 }
  0x50   : > { %v148_v7 = vshrl.u32 %v147_v6, 23  ;;  %v151_v11 = vand.u32 8388607, %v144_v8  ;;  %vm145_vm8 = vcmp.le.f32.partialorder %v144_v8, 0.7853982 }
  0x52   : > { %v1411_v9 = vadd.s32 4294967169, %v148_v7  ;;  %v152_v14 = vor.u32 8388608, %v151_v11 }
  0x54   : > { %v154_v10 = vadd.s32 1, %v1411_v9  ;;  %v192_v34 = vshll.u32 %v152_v14, 8 }
  0x56   : > { %vm155_vm0 = vcmp.gt.s32.totalorder %v154_v10, 0 }
  0x57   : > { %v156_v12 = vsel %vm155_vm0, %v154_v10, 0 }
  0x58   : > { %v158_v13 = vand.u32 31, %v156_v12  ;;  %v157_v15 = vshrl.u32 %v156_v12, 5 }
  0x5a   : > { %v159_v16 = vsub.s32 32, %v158_v13  ;;  %v161_v18 = vshll.u32 %v1748_v17, %v158_v13  ;;  %v164_v20 = vshll.u32 %v1749_v19, %v158_v13  ;;  %v167_v22 = vshll.u32 %v1750_v21, %v158_v13 }
  0x5b   : > { %v170_v24 = vshll.u32 %v1751_v23, %v158_v13  ;;  %v173_v26 = vshll.u32 %v1752_v25, %v158_v13  ;;  %vm176_vm1 = vcmp.lt.s32.totalorder %v157_v15, 1  ;;  %vm179_vm2 = vcmp.lt.s32.totalorder %v157_v15, 4 }
  0x5c   : > { %v160_v27 = vshrl.u32 %v1748_v17, %v159_v16  ;;  %v162_v28 = vshrl.u32 %v1749_v19, %v159_v16  ;;  %v165_v29 = vshrl.u32 %v1750_v21, %v159_v16  ;;  %v168_v30 = vshrl.u32 %v1751_v23, %v159_v16 }
  0x5d   : > { %v171_v31 = vshrl.u32 %v1752_v25, %v159_v16  ;;  %v174_v33 = vshrl.u32 %v1753_v32, %v159_v16  ;;  %vm177_vm3 = vcmp.lt.s32.totalorder %v157_v15, 2  ;;  %vm178_vm4 = vcmp.lt.s32.totalorder %v157_v15, 3 }
  0x5e   : > { %v163_v35 = vor.u32 %v162_v28, %v161_v18  ;;  %v166_v36 = vor.u32 %v165_v29, %v164_v20  ;;  %v169_v37 = vor.u32 %v168_v30, %v167_v22  ;;  %v249_v29 = vlaneseq }
  0x5f   : > { %v172_v38 = vor.u32 %v171_v31, %v170_v24  ;;  %v175_v39 = vor.u32 %v174_v33, %v173_v26 }
  0x60   : > { %v180_v40 = vsel %vm176_vm1, %v160_v27, %v163_v35  ;;  %v181_v41 = vsel %vm179_vm2, %v169_v37, 2102212464  ;;  %v184_v42 = vsel %vm176_vm1, %v163_v35, %v166_v36  ;;  %v188_v43 = vsel %vm176_vm1, %v166_v36, %v169_v37 }
  0x61   : > { %v182_v44 = vsel %vm178_vm4, %v166_v36, %v181_v41  ;;  %v185_v45 = vsel %vm179_vm2, %v172_v38, 920167782  ;;  %v189_v46 = vsel %vm179_vm2, %v175_v39, 1326507024  ;;  %v250_v31 = vshrl.u32 %v249_v29, 7 }
  0x62   : > { %v186_v47 = vsel %vm178_vm4, %v169_v37, %v185_v45  ;;  %v190_v48 = vsel %vm178_vm4, %v172_v38, %v189_v46  ;;  %v183_v49 = vsel %vm177_vm3, %v180_v40, %v182_v44 }
  0x63   : > { %v187_v50 = vsel %vm177_vm3, %v184_v42, %v186_v47  ;;  %v191_v51 = vsel %vm177_vm3, %v188_v43, %v190_v48  ;;  %v199_v56 = vmul.u32 %v192_v34, %v183_v49  ;;  %v251_v35 = vsub.s32 0, %v250_v31 }
  0x64   : > { %v1915_v52 = vmul.u32.u64.low %v192_v34, %v191_v51  ;;  %v1916_v53 = vmul.u32.u64.high %v192_v34, %v191_v51, %v1915_v52  ;;  %v1918_v54 = vmul.u32.u64.low %v192_v34, %v187_v50  ;;  %v1919_v55 = vmul.u32.u64.high %v192_v34, %v187_v50, %v1918_v54 }
  0x65   : > { %v255_v36 = vsub.s32 1, %v250_v31  ;;  %v259_v37 = vsub.s32 2, %v250_v31  ;;  %v263_v39 = vsub.s32 3, %v250_v31  ;;  %v267_v40 = vsub.s32 4, %v250_v31 }
  0x66   : > { %vm201_vm5 = vc.u32 %v1916_v53, %v1918_v54  ;;  %v202_v57 = vadd.s32 1, %v1919_v55  ;;  %v200_v9 = vadd.s32 %v1918_v54, %v1916_v53  ;;  %v271_v42 = vsub.s32 5, %v250_v31 }
  0x67   : > { %v275_v43 = vsub.s32 6, %v250_v31  ;;  %v279_v44 = vsub.s32 7, %v250_v31 }
  0x68   : > { %v203_v58 = vsel %vm201_vm5, %v202_v57, %v1919_v55 }
  0x69   : > { %v204_v59 = vadd.s32 %v203_v58, %v199_v56 }
  0x6b   : > { %v205_v60 = vadd.s32 536870912, %v204_v59 }
  0x6d   : > { %v206_v61 = vshrl.u32 %v205_v60, 30 }
  0x6f   : > { %v207_v62 = vshll.u32 %v206_v61, 30  ;;  %v230_v21 = vsub.s32 4, %v206_v61 }
  0x71   : > { %v208_v63 = vsub.s32 %v204_v59, %v207_v62  ;;  %v231_v24 = vsel %vm146_vm7, %v230_v21, %v206_v61 }
  0x72   : > { %v233_v27 = vsel %vm145_vm8, 0, %v231_v24 }
  0x73   : > { %v210_v3 = vsub.s32 0, %v208_v63  ;;  %v237_v28 = vadd.s32 3, %v233_v27 }
  0x75   : > { %v1412_v4 = vmin.u32 %v210_v3, %v208_v63  ;;  %v238_v30 = vand.u32 3, %v237_v28 }
  0x77   : > { %v212_v6 = vclz %v1412_v4  ;;  %vm243_vm9 = vcmp.eq.s32.totalorder %v238_v30, 2  ;;  %vm240_vm10 = vcmp.eq.s32.totalorder %v238_v30, 0  ;;  %vm239_vm11 = vcmp.lt.s32.totalorder %v238_v30, 2 }
  0x79   : > { %v1413_v7 = vadd.s32 4294967294, %v212_v6 }
  0x7b   : > { %vm1414_vm6 = vcmp.lt.s32.totalorder %v1413_v7, 0 }
  0x7c   : > { %v215_v10 = vsel %vm1414_vm6, 0, %v1413_v7 }
  0x7d   : > { %v216_v11 = vsub.s32 32, %v215_v10  ;;  %v217_v12 = vshll.u32 %v208_v63, %v215_v10  ;;  %v220_v13 = vsub.s32 4294967266, %v215_v10 }
  0x7f   : > { %v218_v14 = vshrl.u32 %v200_v9, %v216_v11  ;;  %v221_v15 = vadd.s32 127, %v220_v13 }
  0x81   : > { %v219_v16 = vor.u32 %v218_v14, %v217_v12  ;;  %v222_v17 = vshll.u32 %v221_v15, 23 }
  0x83   : > { %v223_v18 = vor.u32 4788187, %v222_v17  ;;  %v226_v19 = vcvt.s32.f32 %v219_v16 }
  0x85   : > { %v224_v20 = vand.u32 2147483647, %v223_v18 }
  0x87   : > { %v227_v22 = vmul.f32 %v226_v19, %v224_v20 }
  0x89   : > { %v228_v23 = vxor.u32 2147483648, %v227_v22 }
  0x8b   : > { %v229_v25 = vsel %vm146_vm7, %v228_v23, %v227_v22 }
  0x8c   : > { %v232_v26 = vsel %vm145_vm8, %v1909_v5, %v229_v25 }
  0x8d   : > { %1583 = vcosq.f32 %v232_v26 }
  0x8e   : > { %1585 = vsinq.f32 %v232_v26 }
  0x97   : > { %v1584_v32 = vpop.eup %1583 }
  0x98   : > { %v1586_v33 = vpop.eup %1585  ;;  %v244_v34 = vxor.u32 2147483648, %v1584_v32 }
  0x99   : > { %v241_v8 = vxor.u32 2147483648, %v1586_v33 }
  0x9a   : > { %v245_v38 = vsel %vm243_vm9, %v244_v34, %v1586_v33 }
  0x9b   : > { %v242_v41 = vsel %vm240_vm10, %v1584_v32, %v241_v8 }
  0x9c   : > { %v246_v45 = vsel %vm239_vm11, %v242_v41, %v245_v38 }
  0x9d   : > { %v247_v46 = vsel %vm236_vm12, nan, %v246_v45 }
  0x9e   : > { %v252_v47 = vrot.slane %v247_v46, %v251_v35  ;;  %v256_v48 = vrot.slane %v247_v46, %v255_v36  ;;  %v260_v5 = vrot.slane %v247_v46, %v259_v37  ;;  %v264_v49 = vrot.slane %v247_v46, %v263_v39 }
  0x9f   : > { %v268_v50 = vrot.slane %v247_v46, %v267_v40  ;;  %v272_v51 = vrot.slane %v247_v46, %v271_v42  ;;  %v276_v52 = vrot.slane %v247_v46, %v275_v43  ;;  %v280_v53 = vrot.slane %v247_v46, %v279_v44 }
  0xa0   : > { %289 = vst [vmem:[%s1903_s4] sm:$0xff] %v252_v47  ;;  %290 = vst [vmem:[%s1903_s4 + $0x8] sm:$0xff] %v256_v48 }
  0xa1   : > { %291 = vst [vmem:[%s1903_s4 + $0x10] sm:$0xff] %v260_v5  ;;  %292 = vst [vmem:[%s1903_s4 + $0x18] sm:$0xff] %v264_v49 }
  0xa2   : > { %293 = vst [vmem:[%s1903_s4 + $0x20] sm:$0xff] %v268_v50  ;;  %294 = vst [vmem:[%s1903_s4 + $0x28] sm:$0xff] %v272_v51 }
  0xa3   : > { %295 = vst [vmem:[%s1903_s4 + $0x30] sm:$0xff] %v276_v52  ;;  %296 = vst [vmem:[%s1903_s4 + $0x38] sm:$0xff] %v280_v53 }
  0xa4 PF: > { %299 = sbr.rel (%p1899_p10) target bundleno = 420 (0x1a4), region = 36  ;;  %s300_s14 = sadd.s32 (!%p1899_p10), 16, %s1887_s29  ;;  %v304_v54 = vlaneseq (!%p1899_p10)  ;;  %v306_v55 = vstv (!%p1899_p10), %s1882_s27 }
  0xa5   : > { %s301_s15 = scvt.s32.f32 (!%p1899_p10), %s300_s14 }
  0xa6   : > { %v305_v56 = vshrl.u32 (!%p1899_p10), %v304_v54, 7 }
  0xa7   : > { %v302_v57 = vstv (!%p1899_p10), %s301_s15 }
  0xa8   : > { %v303_v58 = vadd.f32 (!%p1899_p10), %v302_v57, %v1897_v2  ;;  %v307_v59 = vadd.s32 (!%p1899_p10), %v306_v55, %v305_v56  ;;  %v312_v60 = vsub.s32 (!%p1899_p10), 0, %v305_v56  ;;  %v1943_v61 = vsub.s32 (!%p1899_p10), 1, %v305_v56 }
  0xa9   : > { %v1945_v62 = vsub.s32 (!%p1899_p10), 2, %v305_v56  ;;  %v1947_v63 = vsub.s32 (!%p1899_p10), 3, %v305_v56  ;;  %v328_v3 = vsub.s32 (!%p1899_p10), 4, %v305_v56  ;;  %v332_v4 = vsub.s32 (!%p1899_p10), 5, %v305_v56 }
  0xaa   : > { %v308_v6 = vcvt.s32.f32 (!%p1899_p10), %v307_v59  ;;  %v313_v7 = vrot.slane (!%p1899_p10), %v303_v58, %v312_v60  ;;  %v317_v9 = vrot.slane (!%p1899_p10), %v303_v58, %v1943_v61  ;;  %v336_v10 = vsub.s32 (!%p1899_p10), 6, %v305_v56 }
  0xab   : > { %v321_v11 = vrot.slane %v303_v58, %v1945_v62  ;;  %v329_v12 = vrot.slane %v303_v58, %v328_v3  ;;  %v333_v13 = vrot.slane %v303_v58, %v332_v4  ;;  %v340_v14 = vsub.s32 7, %v305_v56 }
  0xac   : > { %v337_v2 = vrot.slane %v303_v58, %v336_v10  ;;  %v350_v15 = vsub.f32 %v313_v7, %v308_v6  ;;  %v351_v16 = vsub.f32 %v317_v9, %v308_v6  ;;  %v325_v17 = vrot.slane %v303_v58, %v1947_v63 }
  0xad   : > { %v352_v18 = vsub.f32 %v321_v11, %v308_v6  ;;  %v354_v19 = vsub.f32 %v329_v12, %v308_v6  ;;  %v355_v20 = vsub.f32 %v333_v13, %v308_v6  ;;  %v341_v21 = vrot.slane %v303_v58, %v340_v14 }
  0xae   : > { %v356_v22 = vsub.f32 %v337_v2, %v308_v6  ;;  %v358_v23 = vmax.f32 %v350_v15, 0.0  ;;  %v359_v24 = vmax.f32 %v351_v16, 0.0  ;;  %v353_v31 = vsub.f32 %v325_v17, %v308_v6 }
  0xaf   : > { %v360_v25 = vmax.f32 %v352_v18, 0.0  ;;  %v362_v26 = vmax.f32 %v354_v19, 0.0  ;;  %v363_v27 = vmax.f32 %v355_v20, 0.0  ;;  %v357_v28 = vsub.f32 %v341_v21, %v308_v6 }
  0xb0   : > { %v364_v29 = vmax.f32 %v356_v22, 0.0  ;;  %v366_v30 = vmin.f32 %v358_v23, 32.0  ;;  %v367_v32 = vmin.f32 %v359_v24, 32.0  ;;  %v378_v36 = vrot.slane %v1893_v0, %v312_v60 }
  0xb1   : > { %v370_v33 = vmin.f32 %v362_v26, 32.0  ;;  %v371_v34 = vmin.f32 %v363_v27, 32.0  ;;  %v365_v35 = vmax.f32 %v357_v28, 0.0  ;;  %v382_v37 = vrot.slane %v1893_v0, %v1943_v61 }
  0xb2   : > { %v372_v8 = vmin.f32 %v364_v29, 32.0  ;;  %v368_v38 = vmin.f32 %v360_v25, 32.0  ;;  %v386_v39 = vrot.slane %v1893_v0, %v1945_v62  ;;  %v394_v40 = vrot.slane %v1893_v0, %v328_v3 }
  0xb3   : > { %v398_v41 = vrot.slane %v1893_v0, %v332_v4  ;;  %v373_v42 = vmin.f32 %v365_v35, 32.0  ;;  %v402_v43 = vrot.slane %v1893_v0, %v336_v10  ;;  %v406_v44 = vrot.slane %v1893_v0, %v340_v14 }
  0xb4   : > { %v415_v45 = vmul.f32 %v378_v36, %v366_v30  ;;  %v361_v46 = vmax.f32 %v353_v31, 0.0  ;;  %v416_v47 = vmul.f32 %v382_v37, %v367_v32  ;;  %v419_v48 = vmul.f32 %v394_v40, %v370_v33 }
  0xb5   : > { %v420_v5 = vmul.f32 %v398_v41, %v371_v34  ;;  %v421_v49 = vmul.f32 %v402_v43, %v372_v8  ;;  %v422_v50 = vmul.f32 %v406_v44, %v373_v42  ;;  %v427_v51 = vrot.slane %v1895_v1, %v312_v60 }
  0xb6   : > { %v417_v52 = vmul.f32 %v386_v39, %v368_v38  ;;  %v431_v53 = vrot.slane %v1895_v1, %v1943_v61  ;;  %v435_v54 = vrot.slane %v1895_v1, %v1945_v62  ;;  %v443_v55 = vrot.slane %v1895_v1, %v328_v3 }
  0xb7   : > { %v447_v56 = vrot.slane %v1895_v1, %v332_v4  ;;  %v451_v57 = vrot.slane %v1895_v1, %v336_v10  ;;  %v455_v58 = vrot.slane %v1895_v1, %v340_v14  ;;  %v1970_v59 = vadd.f32 %v427_v51, %v415_v45 }
  0xb8   : > { %v369_v6 = vmin.f32 %v361_v46, 32.0  ;;  %v390_v60 = vrot.slane %v1893_v0, %v1947_v63  ;;  %v1974_v7 = vadd.f32 %v431_v53, %v416_v47  ;;  %v1976_v61 = vadd.f32 %v443_v55, %v419_v48 }
  0xb9   : > { %v1978_v9 = vadd.f32 %v447_v56, %v420_v5  ;;  %v1980_v62 = vadd.f32 %v451_v57, %v421_v49  ;;  %v1982_v3 = vadd.f32 %v455_v58, %v422_v50  ;;  %v472_v4 = vand.u32 2147483647, %v1970_v59 }
  0xba   : > { %v1985_v10 = vadd.f32 %v435_v54, %v417_v52  ;;  %v475_v11 = vand.u32 2139095040, %v1970_v59  ;;  %v576_v12 = vand.u32 2147483647, %v1974_v7  ;;  %v579_v13 = vand.u32 2139095040, %v1974_v7 }
  0xbb   : > { %v479_v0 = vand.u32 8388607, %v472_v4  ;;  %v418_v14 = vmul.f32 %v390_v60, %v369_v6  ;;  %v439_v15 = vrot.slane %v1895_v1, %v1947_v63  ;;  %v1754_v37 = vmov 683565275  }
  0xbc   : > { %v476_v2 = vshrl.u32 %v475_v11, 23  ;;  %v580_v16 = vshrl.u32 %v579_v13, 23  ;;  %v583_v17 = vand.u32 8388607, %v576_v12  ;;  %v683_v19 = vand.u32 2139095040, %v1985_v10 }
  0xbd   : > { %v480_v20 = vor.u32 8388608, %v479_v0  ;;  %v680_v23 = vand.u32 2147483647, %v1985_v10  ;;  %v1998_v25 = vadd.f32 %v439_v15, %v418_v14  ;;  %v1755_v39 = vmov 2475754826  }
  0xbe   : > { %v1415_v18 = vadd.s32 4294967169, %v476_v2  ;;  %v1419_v21 = vadd.s32 4294967169, %v580_v16  ;;  %v684_v24 = vshrl.u32 %v683_v19, 23  ;;  %v584_v26 = vor.u32 8388608, %v583_v17 }
  0xbf   : > { %v2000_v63 = vshll.u32 %v480_v20, 8  ;;  %v2004_v32 = vand.u32 8388607, %v680_v23  ;;  %v787_v8 = vand.u32 2139095040, %v1998_v25  ;;  %v1756_v41 = vmov 2131351028  }
  0xc0   : > { %v482_v22 = vadd.s32 1, %v1415_v18  ;;  %v586_v27 = vadd.s32 1, %v1419_v21  ;;  %v1423_v28 = vadd.s32 4294967169, %v684_v24  ;;  %v2006_v34 = vshll.u32 %v584_v26, 8 }
  0xc1   : > { %v1757_v43 = vmov 2102212464   ;;  %v1758_v45 = vmov 920167782   ;;  %v1759_v52 = vmov 1326507024  }
  0xc2   : > { %vm483_vm13 = vcmp.gt.s32.totalorder %v482_v22, 0  ;;  %vm587_vm14 = vcmp.gt.s32.totalorder %v586_v27, 0  ;;  %v2008_v35 = vadd.s32 1, %v1423_v28  ;;  %vm474_vm10 = vcmp.lt.s32.totalorder %v1970_v59, 0 }
  0xc3   : > { %v484_v1 = vsel %vm483_vm13, %v482_v22, 0  ;;  %v588_v31 = vsel %vm587_vm14, %v586_v27, 0  ;;  %vm2111_vm11 = vcmp.le.f32.partialorder %v472_v4, 0.7853982  ;;  %vm578_vm12 = vcmp.lt.s32.totalorder %v1974_v7, 0 }
  0xc4   : > { %v485_v29 = vshrl.u32 %v484_v1, 5  ;;  %v486_v30 = vand.u32 31, %v484_v1  ;;  %v590_v33 = vand.u32 31, %v588_v31  ;;  %v2016_v47 = vshrl.u32 %v588_v31, 5 }
  0xc5   : > { %vm691_vm8 = vcmp.gt.s32.totalorder %v2008_v35, 0 }
  0xc6   : > { %v487_v36 = vsub.s32 32, %v486_v30  ;;  %v489_v38 = vshll.u32 %v1754_v37, %v486_v30  ;;  %v492_v40 = vshll.u32 %v1755_v39, %v486_v30  ;;  %v495_v42 = vshll.u32 %v1756_v41, %v486_v30 }
  0xc7   : > { %v498_v44 = vshll.u32 %v1757_v43, %v486_v30  ;;  %v501_v46 = vshll.u32 %v1758_v45, %v486_v30  ;;  %vm504_vm15 = vcmp.lt.s32.totalorder %v485_v29, 1  ;;  %vm505_vm0 = vcmp.lt.s32.totalorder %v485_v29, 2 }
  0xc8   : > { %v488_v48 = vshrl.u32 %v1754_v37, %v487_v36  ;;  %v490_v5 = vshrl.u32 %v1755_v39, %v487_v36  ;;  %v493_v49 = vshrl.u32 %v1756_v41, %v487_v36  ;;  %v496_v50 = vshrl.u32 %v1757_v43, %v487_v36 }
  0xc9   : > { %v499_v51 = vshrl.u32 %v1758_v45, %v487_v36  ;;  %v502_v53 = vshrl.u32 %v1759_v52, %v487_v36  ;;  %vm507_vm1 = vcmp.lt.s32.totalorder %v485_v29, 4  ;;  %v591_v57 = vsub.s32 32, %v590_v33 }
  0xca   : > { %v491_v54 = vor.u32 %v490_v5, %v489_v38  ;;  %v494_v55 = vor.u32 %v493_v49, %v492_v40  ;;  %v497_v56 = vor.u32 %v496_v50, %v495_v42  ;;  %vm506_vm2 = vcmp.lt.s32.totalorder %v485_v29, 3 }
  0xcb   : > { %v500_v58 = vor.u32 %v499_v51, %v498_v44  ;;  %v503_v6 = vor.u32 %v502_v53, %v501_v46  ;;  %v593_v60 = vshll.u32 %v1754_v37, %v590_v33  ;;  %v596_v17 = vshll.u32 %v1755_v39, %v590_v33 }
  0xcc   : > { %v508_v11 = vsel %vm504_vm15, %v488_v48, %v491_v54  ;;  %v509_v0 = vsel %vm507_vm1, %v497_v56, 2102212464  ;;  %v512_v13 = vsel %vm504_vm15, %v491_v54, %v494_v55  ;;  %v516_v2 = vsel %vm504_vm15, %v494_v55, %v497_v56 }
  0xcd   : > { %v510_v14 = vsel %vm506_vm2, %v494_v55, %v509_v0  ;;  %v513_v15 = vsel %vm507_vm1, %v500_v58, 920167782  ;;  %v517_v16 = vsel %vm507_vm1, %v503_v6, 1326507024  ;;  %v592_v20 = vshrl.u32 %v1754_v37, %v591_v57 }
  0xce   : > { %v514_v18 = vsel %vm506_vm2, %v497_v56, %v513_v15  ;;  %v518_v19 = vsel %vm506_vm2, %v500_v58, %v517_v16  ;;  %v594_v21 = vshrl.u32 %v1755_v39, %v591_v57  ;;  %v511_v22 = vsel %vm505_vm0, %v508_v11, %v510_v14 }
  0xcf   : > { %v515_v24 = vsel %vm505_vm0, %v512_v13, %v514_v18  ;;  %v519_v26 = vsel %vm505_vm0, %v516_v2, %v518_v19  ;;  %v597_v27 = vshrl.u32 %v1756_v41, %v591_v57  ;;  %v599_v40 = vshll.u32 %v1756_v41, %v590_v33 }
  0xd0   : > { %v2036_v28 = vmul.u32.u64.low %v2000_v63, %v519_v26  ;;  %v2037_v1 = vmul.u32.u64.high %v2000_v63, %v519_v26, %v2036_v28  ;;  %v2040_v30 = vmul.u32.u64.low %v2000_v63, %v515_v24  ;;  %v2041_v31 = vmul.u32.u64.high %v2000_v63, %v515_v24, %v2040_v30 }
  0xd1   : > { %v595_v36 = vor.u32 %v594_v21, %v593_v60  ;;  %v598_v38 = vor.u32 %v597_v27, %v596_v17  ;;  %v600_v42 = vshrl.u32 %v1757_v43, %v591_v57  ;;  %v602_v29 = vshll.u32 %v1757_v43, %v590_v33 }
  0xd2   : > { %v603_v44 = vshrl.u32 %v1758_v45, %v591_v57  ;;  %v605_v46 = vshll.u32 %v1758_v45, %v590_v33  ;;  %v606_v48 = vshrl.u32 %v1759_v52, %v591_v57  ;;  %v527_v5 = vmul.u32 %v2000_v63, %v511_v22 }
  0xd3   : > { %v601_v49 = vor.u32 %v600_v42, %v599_v40  ;;  %vm608_vm3 = vcmp.lt.s32.totalorder %v2016_v47, 1  ;;  %vm609_vm4 = vcmp.lt.s32.totalorder %v2016_v47, 2  ;;  %vm529_vm5 = vc.u32 %v2037_v1, %v2040_v30 }
  0xd4   : > { %v530_v50 = vadd.s32 1, %v2041_v31  ;;  %v604_v51 = vor.u32 %v603_v44, %v602_v29  ;;  %vm610_vm6 = vcmp.lt.s32.totalorder %v2016_v47, 3  ;;  %v607_v53 = vor.u32 %v606_v48, %v605_v46 }
  0xd5   : > { %vm611_vm7 = vcmp.lt.s32.totalorder %v2016_v47, 4  ;;  %v612_v33 = vsel %vm608_vm3, %v592_v20, %v595_v36  ;;  %v616_v54 = vsel %vm608_vm3, %v595_v36, %v598_v38  ;;  %v620_v57 = vsel %vm608_vm3, %v598_v38, %v601_v49 }
  0xd6   : > { %v531_v63 = vsel %vm529_vm5, %v530_v50, %v2041_v31  ;;  %v613_v55 = vsel %vm611_vm7, %v601_v49, 2102212464  ;;  %v617_v56 = vsel %vm611_vm7, %v604_v51, 920167782  ;;  %v621_v11 = vsel %vm611_vm7, %v607_v53, 1326507024 }
  0xd7   : > { %v532_v58 = vadd.s32 %v531_v63, %v527_v5  ;;  %v614_v6 = vsel %vm610_vm6, %v598_v38, %v613_v55  ;;  %v618_v60 = vsel %vm610_vm6, %v601_v49, %v617_v56  ;;  %v622_v2 = vsel %vm610_vm6, %v604_v51, %v621_v11 }
  0xd8   : > { %v615_v0 = vsel %vm609_vm4, %v612_v33, %v614_v6  ;;  %v619_v13 = vsel %vm609_vm4, %v616_v54, %v618_v60  ;;  %v623_v15 = vsel %vm609_vm4, %v620_v57, %v622_v2  ;;  %v692_v20 = vsel %vm691_vm8, %v2008_v35, 0 }
  0xd9   : > { %v533_v14 = vadd.s32 536870912, %v532_v58  ;;  %v2067_v16 = vmul.u32.u64.low %v2006_v34, %v619_v13  ;;  %v2068_v17 = vmul.u32.u64.high %v2006_v34, %v619_v13, %v2067_v16  ;;  %v694_v22 = vand.u32 31, %v692_v20 }
  0xda   : > { %v2072_v18 = vmul.u32.u64.low %v2006_v34, %v623_v15  ;;  %v2073_v19 = vmul.u32.u64.high %v2006_v34, %v623_v15, %v2072_v18  ;;  %v784_v24 = vand.u32 2147483647, %v1998_v25  ;;  %v631_v26 = vmul.u32 %v2006_v34, %v615_v0 }
  0xdb   : > { %v534_v21 = vshrl.u32 %v533_v14, 30  ;;  %v688_v47 = vor.u32 8388608, %v2004_v32  ;;  %v788_v27 = vshrl.u32 %v787_v8, 23  ;;  %v634_v31 = vadd.s32 1, %v2068_v17 }
  0xdc   : > { %vm633_vm9 = vc.u32 %v2073_v19, %v2067_v16  ;;  %v695_v36 = vsub.s32 32, %v694_v22  ;;  %v2090_v34 = vand.u32 8388607, %v784_v24  ;;  %v2092_v40 = vshrl.u32 %v692_v20, 5 }
  0xdd   : > { %v535_v28 = vshll.u32 %v534_v21, 30  ;;  %v635_v38 = vsel %vm633_vm9, %v634_v31, %v2068_v17  ;;  %v2094_v8 = vshll.u32 %v688_v47, 8  ;;  %v1427_v42 = vadd.s32 4294967169, %v788_v27 }
  0xde   : > { %v636_v32 = vadd.s32 %v635_v38, %v631_v26  ;;  %v558_v44 = vsub.s32 4, %v534_v21  ;;  %v697_v46 = vshll.u32 %v1754_v37, %v694_v22  ;;  %v700_v48 = vshll.u32 %v1755_v39, %v694_v22 }
  0xdf   : > { %v2085_v35 = vsub.s32 %v532_v58, %v535_v28  ;;  %v698_v49 = vshrl.u32 %v1755_v39, %v695_v36  ;;  %v701_v50 = vshrl.u32 %v1756_v41, %v695_v36  ;;  %v703_v51 = vshll.u32 %v1756_v41, %v694_v22 }
  0xe0   : > { %v637_v5 = vadd.s32 536870912, %v636_v32  ;;  %v704_v33 = vshrl.u32 %v1757_v43, %v695_v36  ;;  %v706_v54 = vshll.u32 %v1757_v43, %v694_v22  ;;  %v707_v63 = vshrl.u32 %v1758_v45, %v695_v36 }
  0xe1   : > { %v538_v29 = vsub.s32 0, %v2085_v35  ;;  %v709_v56 = vshll.u32 %v1758_v45, %v694_v22  ;;  %v710_v57 = vshrl.u32 %v1759_v52, %v695_v36  ;;  %v792_v58 = vor.u32 8388608, %v2090_v34 }
  0xe2   : > { %v638_v55 = vshrl.u32 %v637_v5, 30  ;;  %v528_v60 = vadd.s32 %v2040_v30, %v2037_v1  ;;  %v559_v0 = vsel %vm474_vm10, %v558_v44, %v534_v21  ;;  %v794_v13 = vadd.s32 1, %v1427_v42 }
  0xe3   : > { %v1416_v53 = vmin.u32 %v538_v29, %v2085_v35  ;;  %v696_v14 = vshrl.u32 %v1754_v37, %v695_v36  ;;  %v699_v15 = vor.u32 %v698_v49, %v697_v46  ;;  %v702_v17 = vor.u32 %v701_v50, %v700_v48 }
  0xe4   : > { %v639_v2 = vshll.u32 %v638_v55, 30  ;;  %v705_v4 = vor.u32 %v704_v33, %v703_v51  ;;  %v708_v20 = vor.u32 %v707_v63, %v706_v54  ;;  %vm712_vm13 = vcmp.lt.s32.totalorder %v2092_v40, 1 }
  0xe5   : > { %v540_v11 = vclz %v1416_v53  ;;  %v662_v1 = vsub.s32 4, %v638_v55  ;;  %v711_v30 = vor.u32 %v710_v57, %v709_v56  ;;  %vm715_vm14 = vcmp.lt.s32.totalorder %v2092_v40, 4 }
  0xe6   : > { %v2122_v22 = vsub.s32 %v636_v32, %v639_v2  ;;  %vm2127_vm0 = vcmp.le.f32.partialorder %v576_v12, 0.7853982  ;;  %vm713_vm1 = vcmp.lt.s32.totalorder %v2092_v40, 2  ;;  %vm714_vm2 = vcmp.lt.s32.totalorder %v2092_v40, 3 }
  0xe7   : > { %v1417_v18 = vadd.s32 4294967294, %v540_v11  ;;  %v717_v26 = vsel %vm715_vm14, %v705_v4, 2102212464  ;;  %v716_v28 = vsel %vm712_vm13, %v696_v14, %v699_v15  ;;  %v720_v31 = vsel %vm712_vm13, %v699_v15, %v702_v17 }
  0xe8   : > { %v642_v27 = vsub.s32 0, %v2122_v22  ;;  %v721_v32 = vsel %vm715_vm14, %v708_v20, 920167782  ;;  %v718_v29 = vsel %vm714_vm2, %v702_v17, %v717_v26  ;;  %v724_v46 = vsel %vm712_vm13, %v702_v17, %v705_v4 }
  0xe9   : > { %vm1418_vm15 = vcmp.lt.s32.totalorder %v1417_v18, 0  ;;  %v722_v44 = vsel %vm714_vm2, %v705_v4, %v721_v32  ;;  %v725_v49 = vsel %vm715_vm14, %v711_v30, 1326507024  ;;  %v561_v50 = vsel %vm2111_vm11, 0, %v559_v0 }
  0xea   : > { %v543_v47 = vsel %vm1418_vm15, 0, %v1417_v18  ;;  %v1420_v42 = vmin.u32 %v642_v27, %v2122_v22  ;;  %v632_v51 = vadd.s32 %v2067_v16, %v2073_v19  ;;  %v663_v33 = vsel %vm578_vm12, %v662_v1, %v638_v55 }
  0xeb   : > { %v544_v12 = vsub.s32 32, %v543_v47  ;;  %v545_v36 = vshll.u32 %v2085_v35, %v543_v47  ;;  %v548_v38 = vsub.s32 4294967266, %v543_v47  ;;  %v723_v35 = vsel %vm713_vm1, %v720_v31, %v722_v44 }
  0xec   : > { %v644_v53 = vclz %v1420_v42  ;;  %v719_v56 = vsel %vm713_vm1, %v716_v28, %v718_v29  ;;  %v726_v57 = vsel %vm714_vm2, %v708_v20, %v725_v49  ;;  %v565_v15 = vadd.s32 3, %v561_v50 }
  0xed   : > { %v546_v48 = vshrl.u32 %v528_v60, %v544_v12  ;;  %v549_v5 = vadd.s32 127, %v548_v38  ;;  %v727_v11 = vsel %vm713_vm1, %v724_v46, %v726_v57  ;;  %v665_v17 = vsel %vm2127_vm0, 0, %v663_v33 }
  0xee   : > { %v1421_v60 = vadd.s32 4294967294, %v644_v53  ;;  %v2167_v0 = vmul.u32.u64.low %v2094_v8, %v723_v35  ;;  %v2168_v2 = vmul.u32.u64.high %v2094_v8, %v723_v35, %v2167_v0  ;;  %vm795_vm4 = vcmp.gt.s32.totalorder %v794_v13, 0 }
  0xef   : > { %v547_v54 = vor.u32 %v546_v48, %v545_v36  ;;  %v550_v63 = vshll.u32 %v549_v5, 23  ;;  %v2172_v55 = vmul.u32.u64.low %v2094_v8, %v727_v11  ;;  %v2173_v14 = vmul.u32.u64.high %v2094_v8, %v727_v11, %v2172_v55 }
  0xf0   : > { %vm1422_vm3 = vcmp.lt.s32.totalorder %v1421_v60, 0  ;;  %v735_v4 = vmul.u32 %v2094_v8, %v719_v56  ;;  %v796_v20 = vsel %vm795_vm4, %v794_v13, 0  ;;  %v738_v47 = vadd.s32 1, %v2168_v2 }
  0xf1   : > { %v551_v16 = vor.u32 4788187, %v550_v63  ;;  %v554_v19 = vcvt.s32.f32 %v547_v54  ;;  %v647_v40 = vsel %vm1422_vm3, 0, %v1421_v60  ;;  %vm737_vm5 = vc.u32 %v2173_v14, %v2167_v0 }
  0xf2   : > { %v648_v1 = vsub.s32 32, %v647_v40  ;;  %v649_v30 = vshll.u32 %v2122_v22, %v647_v40  ;;  %v652_v26 = vsub.s32 4294967266, %v647_v40  ;;  %v2184_v28 = vshll.u32 %v792_v58, 8 }
  0xf3   : > { %v552_v18 = vand.u32 2147483647, %v551_v16  ;;  %v888_v31 = vand.u32 2147483647, %v1976_v61  ;;  %v739_v8 = vsel %vm737_vm5, %v738_v47, %v2168_v2  ;;  %v798_v13 = vand.u32 31, %v796_v20 }
  0xf4   : > { %v650_v12 = vshrl.u32 %v632_v51, %v648_v1  ;;  %v653_v36 = vadd.s32 127, %v652_v26  ;;  %v2188_v22 = vand.u32 3, %v565_v15  ;;  %v669_v32 = vadd.s32 3, %v665_v17 }
  0xf5   : > { %v555_v27 = vmul.f32 %v554_v19, %v552_v18  ;;  %v740_v42 = vadd.s32 %v739_v8, %v735_v4  ;;  %v2190_v46 = vshrl.u32 %v796_v20, 5  ;;  %v799_v48 = vsub.s32 32, %v798_v13 }
  0xf6   : > { %v651_v29 = vor.u32 %v650_v12, %v649_v30  ;;  %v654_v44 = vshll.u32 %v653_v36, 23  ;;  %v801_v5 = vshll.u32 %v1754_v37, %v798_v13  ;;  %v804_v35 = vshll.u32 %v1755_v39, %v798_v13 }
  0xf7   : > { %v556_v38 = vxor.u32 2147483648, %v555_v27  ;;  %v741_v58 = vadd.s32 536870912, %v740_v42  ;;  %v807_v53 = vshll.u32 %v1756_v41, %v798_v13  ;;  %v802_v54 = vshrl.u32 %v1755_v39, %v799_v48 }
  0xf8   : > { %v655_v50 = vor.u32 4788187, %v654_v44  ;;  %v658_v51 = vcvt.s32.f32 %v651_v29  ;;  %v805_v63 = vshrl.u32 %v1756_v41, %v799_v48  ;;  %v808_v57 = vshrl.u32 %v1757_v43, %v799_v48 }
  0xf9   : > { %v557_v34 = vsel %vm474_vm10, %v556_v38, %v555_v27  ;;  %v742_v33 = vshrl.u32 %v741_v58, 30  ;;  %v810_v60 = vshll.u32 %v1757_v43, %v798_v13  ;;  %vm571_vm6 = vcmp.eq.s32.totalorder %v2188_v22, 2 }
  0xfa   : > { %v560_v49 = vsel %vm2111_vm11, %v1970_v59, %v557_v34  ;;  %v656_v56 = vand.u32 2147483647, %v655_v50  ;;  %v2205_v6 = vand.u32 3, %v669_v32  ;;  %vm682_vm7 = vcmp.lt.s32.totalorder %v1985_v10, 0 }
  0xfb   : > { %1587 = vcosq.f32 %v560_v49  ;;  %v743_v11 = vshll.u32 %v742_v33, 30  ;;  %vm816_vm8 = vcmp.lt.s32.totalorder %v2190_v46, 1  ;;  %vm568_vm9 = vcmp.eq.s32.totalorder %v2188_v22, 0 }
  0xfc   : > { %1589 = vsinq.f32 %v560_v49  ;;  %v659_v2 = vmul.f32 %v658_v51, %v656_v56  ;;  %v800_v16 = vshrl.u32 %v1754_v37, %v799_v48  ;;  %v811_v19 = vshrl.u32 %v1758_v45, %v799_v48 }
  0xfd   : > { %v813_v55 = vshll.u32 %v1758_v45, %v798_v13  ;;  %vm567_vm10 = vcmp.lt.s32.totalorder %v2188_v22, 2  ;;  %v2214_v15 = vsub.s32 %v740_v42, %v743_v11  ;;  %v803_v17 = vor.u32 %v802_v54, %v801_v5 }
  0xfe   : > { %v806_v18 = vor.u32 %v805_v63, %v804_v35  ;;  %v814_v40 = vshrl.u32 %v1759_v52, %v799_v48  ;;  %vm564_vm11 = vweird.f32 %v1970_v59  ;;  %v660_v4 = vxor.u32 2147483648, %v659_v2 }
  0xff   : > { %v809_v20 = vor.u32 %v808_v57, %v807_v53  ;;  %v812_v1 = vor.u32 %v811_v19, %v810_v60  ;;  %vm819_vm13 = vcmp.lt.s32.totalorder %v2190_v46, 4  ;;  %v746_v30 = vsub.s32 0, %v2214_v15 }
 0x100   : > { %v766_v26 = vsub.s32 4, %v742_v33  ;;  %vm818_vm14 = vcmp.lt.s32.totalorder %v2190_v46, 3  ;;  %v891_v47 = vand.u32 2139095040, %v1976_v61  ;;  %v661_v27 = vsel %vm578_vm12, %v660_v4, %v659_v2 }
 0x101   : > { %v815_v12 = vor.u32 %v814_v40, %v813_v55  ;;  %v821_v36 = vsel %vm819_vm13, %v809_v20, 2102212464  ;;  %v825_v8 = vsel %vm819_vm13, %v812_v1, 920167782  ;;  %v664_v13 = vsel %vm2127_vm0, %v1974_v7, %v661_v27 }
 0x102   : > { %v1424_v38 = vmin.u32 %v746_v30, %v2214_v15  ;;  %vm817_vm15 = vcmp.lt.s32.totalorder %v2190_v46, 2  ;;  %v824_v32 = vsel %vm816_vm8, %v803_v17, %v806_v18  ;;  %1591 = vcosq.f32 %v664_v13 }
 0x103   : > { %v820_v42 = vsel %vm816_vm8, %v800_v16, %v803_v17  ;;  %v822_v29 = vsel %vm818_vm14, %v806_v18, %v821_v36  ;;  %v826_v44 = vsel %vm818_vm14, %v809_v20, %v825_v8  ;;  %1593 = vsinq.f32 %v664_v13 }
 0x104   : > { %v736_v21 = vadd.s32 %v2167_v0, %v2173_v14  ;;  %v748_v34 = vclz %v1424_v38  ;;  %v828_v58 = vsel %vm816_vm8, %v806_v18, %v809_v20  ;;  %v767_v49 = vsel %vm682_vm7, %v766_v26, %v742_v33 }
 0x105   : > { %v1588_v48 = vpop.eup %1587  ;;  %v827_v50 = vsel %vm817_vm15, %v824_v32, %v826_v44  ;;  %v829_v51 = vsel %vm819_vm13, %v815_v12, 1326507024  ;;  %v823_v0 = vsel %vm817_vm15, %v820_v42, %v822_v29  ;;  %v892_v55 = vshrl.u32 %v891_v47, 23 }
 0x106   : > { %v1590_v5 = vpop.eup %1589  ;;  %v572_v35 = vxor.u32 2147483648, %v1588_v48  ;;  %v1425_v54 = vadd.s32 4294967294, %v748_v34  ;;  %v830_v14 = vsel %vm818_vm14, %v812_v1, %v829_v51  ;;  %v839_v46 = vmul.u32 %v2184_v28, %v823_v0 }
 0x107   : > { %v569_v53 = vxor.u32 2147483648, %v1590_v5  ;;  %v831_v33 = vsel %vm817_vm15, %v828_v58, %v830_v14  ;;  %v2260_v56 = vmul.u32.u64.low %v2184_v28, %v827_v50  ;;  %v2261_v57 = vmul.u32.u64.high %v2184_v28, %v827_v50, %v2260_v56 }
 0x108   : > { %v573_v63 = vsel %vm571_vm6, %v572_v35, %v1590_v5  ;;  %vm1426_vm12 = vcmp.lt.s32.totalorder %v1425_v54, 0  ;;  %v2267_v11 = vmul.u32.u64.low %v2184_v28, %v831_v33  ;;  %v2268_v2 = vmul.u32.u64.high %v2184_v28, %v831_v33, %v2267_v11 }
 0x109   : > { %v570_v60 = vsel %vm568_vm9, %v1588_v48, %v569_v53  ;;  %v751_v19 = vsel %vm1426_vm12, 0, %v1425_v54  ;;  %vm672_vm0 = vcmp.eq.s32.totalorder %v2205_v6, 0  ;;  %vm2279_vm1 = vcmp.le.f32.partialorder %v680_v23, 0.7853982 }
 0x10a   : > { %v574_v16 = vsel %vm567_vm10, %v570_v60, %v573_v63  ;;  %v752_v18 = vsub.s32 32, %v751_v19  ;;  %v753_v40 = vshll.u32 %v2214_v15, %v751_v19  ;;  %v756_v4 = vsub.s32 4294967266, %v751_v19 }
 0x10b   : > { %v575_v17 = vsel %vm564_vm11, nan, %v574_v16  ;;  %v842_v22 = vadd.s32 1, %v2261_v57  ;;  %v1431_v1 = vadd.s32 4294967169, %v892_v55  ;;  %vm675_vm2 = vcmp.eq.s32.totalorder %v2205_v6, 2 }
 0x10c   : > { %1304 = vst [vmem:[%s1903_s4] sm:$0xff] %v575_v17  ;;  %v754_v59 = vshrl.u32 %v736_v21, %v752_v18  ;;  %v757_v28 = vadd.s32 127, %v756_v4  ;;  %vm841_vm3 = vc.u32 %v2268_v2, %v2260_v56  ;;  %v1592_v15 = vpop.eup %1591  ;;  %v769_v30 = vsel %vm2279_vm1, 0, %v767_v49 }
 0x10d   : > { %v843_v23 = vsel %vm841_vm3, %v842_v22, %v2261_v57  ;;  %v895_v26 = vand.u32 8388607, %v888_v31  ;;  %v898_v47 = vadd.s32 1, %v1431_v1  ;;  %v1594_v27 = vpop.eup %1593  ;;  %v676_v12 = vxor.u32 2147483648, %v1592_v15 }
 0x10e   : > { %v755_v36 = vor.u32 %v754_v59, %v753_v40  ;;  %v758_v8 = vshll.u32 %v757_v28, 23  ;;  %v844_v13 = vadd.s32 %v843_v23, %v839_v46  ;;  %vm668_vm4 = vweird.f32 %v1974_v7 }
 0x10f   : > { %vm671_vm5 = vcmp.lt.s32.totalorder %v2205_v6, 2  ;;  %v673_v38 = vxor.u32 2147483648, %v1594_v27  ;;  %vm899_vm6 = vcmp.gt.s32.totalorder %v898_v47, 0  ;;  %v677_v32 = vsel %vm675_vm2, %v676_v12, %v1594_v27 }
 0x110   : > { %v759_v42 = vor.u32 4788187, %v758_v8  ;;  %v762_v29 = vcvt.s32.f32 %v755_v36  ;;  %v845_v44 = vadd.s32 536870912, %v844_v13  ;;  %v773_v21 = vadd.s32 3, %v769_v30 }
 0x111   : > { %v674_v48 = vsel %vm672_vm0, %v1592_v15, %v673_v38  ;;  %v896_v34 = vor.u32 8388608, %v895_v26  ;;  %v900_v58 = vsel %vm899_vm6, %v898_v47, 0  ;;  %v995_v51 = vand.u32 2139095040, %v1978_v9 }
 0x112   : > { %v678_v5 = vsel %vm671_vm5, %v674_v48, %v677_v32  ;;  %v760_v35 = vand.u32 2147483647, %v759_v42  ;;  %v2299_v7 = vshrl.u32 %v845_v44, 30  ;;  %v902_v50 = vand.u32 31, %v900_v58 }
 0x113   : > { %v679_v49 = vsel %vm668_vm4, nan, %v678_v5  ;;  %v901_v0 = vshrl.u32 %v900_v58, 5  ;;  %v2304_v14 = vand.u32 3, %v773_v21  ;;  %v2307_v33 = vshll.u32 %v896_v34, 8 }
 0x114   : > { %v763_v53 = vmul.f32 %v762_v29, %v760_v35  ;;  %v847_v54 = vshll.u32 %v2299_v7, 30  ;;  %1305 = vst [vmem:[%s1903_s4 + $0x8] sm:$0xff] %v679_v49  ;;  %v903_v6 = vsub.s32 32, %v902_v50  ;;  %v905_v63 = vshll.u32 %v1754_v37, %v902_v50 }
 0x115   : > { %v908_v11 = vshll.u32 %v1755_v39, %v902_v50  ;;  %v911_v16 = vshll.u32 %v1756_v41, %v902_v50  ;;  %v914_v55 = vshll.u32 %v1757_v43, %v902_v50  ;;  %v996_v17 = vshrl.u32 %v995_v51, 23 }
 0x116   : > { %v764_v57 = vxor.u32 2147483648, %v763_v53  ;;  %v2309_v60 = vsub.s32 %v844_v13, %v847_v54  ;;  %v906_v19 = vshrl.u32 %v1755_v39, %v903_v6  ;;  %v909_v46 = vshrl.u32 %v1756_v41, %v903_v6 }
 0x117   : > { %v912_v4 = vshrl.u32 %v1757_v43, %v903_v6  ;;  %vm920_vm8 = vcmp.lt.s32.totalorder %v901_v0, 1  ;;  %v904_v1 = vshrl.u32 %v1754_v37, %v903_v6  ;;  %v915_v28 = vshrl.u32 %v1758_v45, %v903_v6 }
 0x118   : > { %v765_v18 = vsel %vm682_vm7, %v764_v57, %v763_v53  ;;  %v850_v40 = vsub.s32 0, %v2309_v60  ;;  %v907_v59 = vor.u32 %v906_v19, %v905_v63  ;;  %v910_v30 = vor.u32 %v909_v46, %v908_v11 }
 0x119   : > { %v768_v22 = vsel %vm2279_vm1, %v1985_v10, %v765_v18  ;;  %v913_v23 = vor.u32 %v912_v4, %v911_v16  ;;  %v916_v26 = vor.u32 %v915_v28, %v914_v55  ;;  %v917_v47 = vshll.u32 %v1758_v45, %v902_v50 }
 0x11a   : > { %1595 = vcosq.f32 %v768_v22  ;;  %v1428_v15 = vmin.u32 %v850_v40, %v2309_v60  ;;  %v918_v27 = vshrl.u32 %v1759_v52, %v903_v6  ;;  %vm786_vm7 = vcmp.lt.s32.totalorder %v1998_v25, 0 }
 0x11b   : > { %1597 = vsinq.f32 %v768_v22  ;;  %v840_v20 = vadd.s32 %v2260_v56, %v2268_v2  ;;  %v992_v36 = vand.u32 2147483647, %v1978_v9  ;;  %v1435_v8 = vadd.s32 4294967169, %v996_v17 }
 0x11c   : > { %v852_v12 = vclz %v1428_v15  ;;  %vm776_vm9 = vcmp.eq.s32.totalorder %v2304_v14, 0  ;;  %v919_v13 = vor.u32 %v918_v27, %v917_v47  ;;  %vm921_vm10 = vcmp.lt.s32.totalorder %v901_v0, 2 }
 0x11d   : > { %vm922_vm11 = vcmp.lt.s32.totalorder %v901_v0, 3  ;;  %vm923_vm13 = vcmp.lt.s32.totalorder %v901_v0, 4  ;;  %vm775_vm14 = vcmp.lt.s32.totalorder %v2304_v14, 2  ;;  %v924_v32 = vsel %vm920_vm8, %v904_v1, %v907_v59 }
 0x11e   : > { %v1429_v38 = vadd.s32 4294967294, %v852_v12  ;;  %v925_v42 = vsel %vm923_vm13, %v913_v23, 2102212464  ;;  %v928_v29 = vsel %vm920_vm8, %v907_v59, %v910_v30  ;;  %vm772_vm15 = vweird.f32 %v1985_v10 }
 0x11f   : > { %v926_v56 = vsel %vm922_vm11, %v910_v30, %v925_v42  ;;  %v929_v2 = vsel %vm923_vm13, %v916_v26, 920167782  ;;  %v932_v44 = vsel %vm920_vm8, %v910_v30, %v913_v23  ;;  %v933_v48 = vsel %vm923_vm13, %v919_v13, 1326507024 }
 0x120   : > { %vm1430_vm12 = vcmp.lt.s32.totalorder %v1429_v38, 0  ;;  %v870_v21 = vsub.s32 4, %v2299_v7  ;;  %v930_v34 = vsel %vm922_vm11, %v913_v23, %v929_v2  ;;  %v934_v58 = vsel %vm922_vm11, %v916_v26, %v933_v48 }
 0x121   : > { %v855_v5 = vsel %vm1430_vm12, 0, %v1429_v38  ;;  %v927_v35 = vsel %vm921_vm10, %v924_v32, %v926_v56  ;;  %v931_v49 = vsel %vm921_vm10, %v928_v29, %v930_v34  ;;  %v935_v50 = vsel %vm921_vm10, %v932_v44, %v934_v58 }
 0x122   : > { %v856_v51 = vsub.s32 32, %v855_v5  ;;  %v857_v53 = vshll.u32 %v2309_v60, %v855_v5  ;;  %v860_v54 = vsub.s32 4294967266, %v855_v5  ;;  %v1002_v6 = vadd.s32 1, %v1435_v8 }
 0x123   : > { %v2344_v63 = vmul.u32.u64.low %v2307_v33, %v935_v50  ;;  %v2345_v57 = vmul.u32.u64.high %v2307_v33, %v935_v50, %v2344_v63  ;;  %v2348_v11 = vmul.u32.u64.low %v2307_v33, %v931_v49  ;;  %v2349_v16 = vmul.u32.u64.high %v2307_v33, %v931_v49, %v2348_v11 }
 0x124   : > { %v1596_v19 = vpop.eup %1595  ;;  %vm779_vm0 = vcmp.eq.s32.totalorder %v2304_v14, 2  ;;  %v858_v46 = vshrl.u32 %v840_v20, %v856_v51  ;;  %v861_v0 = vadd.s32 127, %v860_v54  ;;  %vm1003_vm1 = vcmp.gt.s32.totalorder %v1002_v6, 0 }
 0x125   : > { %v1598_v55 = vpop.eup %1597  ;;  %v780_v17 = vxor.u32 2147483648, %v1596_v19  ;;  %v871_v60 = vsel %vm786_vm7, %v870_v21, %v2299_v7  ;;  %v999_v18 = vand.u32 8388607, %v992_v36  ;;  %v1004_v40 = vsel %vm1003_vm1, %v1002_v6, 0 }
 0x126   : > { %v777_v4 = vxor.u32 2147483648, %v1598_v55  ;;  %v859_v22 = vor.u32 %v858_v46, %v857_v53  ;;  %v862_v1 = vshll.u32 %v861_v0, 23  ;;  %v943_v59 = vmul.u32 %v2307_v33, %v927_v35 }
 0x127   : > { %v781_v28 = vsel %vm779_vm0, %v780_v17, %v1598_v55  ;;  %vm2361_vm2 = vcmp.le.f32.partialorder %v784_v24, 0.7853982  ;;  %vm945_vm3 = vc.u32 %v2345_v57, %v2348_v11  ;;  %v946_v7 = vadd.s32 1, %v2349_v16 }
 0x128   : > { %v778_v30 = vsel %vm776_vm9, %v1596_v19, %v777_v4  ;;  %v863_v23 = vor.u32 4788187, %v862_v1  ;;  %v866_v26 = vcvt.s32.f32 %v859_v22  ;;  %v1006_v47 = vand.u32 31, %v1004_v40 }
 0x129   : > { %v782_v33 = vsel %vm775_vm14, %v778_v30, %v781_v28  ;;  %v873_v24 = vsel %vm2361_vm2, 0, %v871_v60  ;;  %v947_v27 = vsel %vm945_vm3, %v946_v7, %v2349_v16  ;;  %v1000_v20 = vor.u32 8388608, %v999_v18 }
 0x12a   : > { %v783_v12 = vsel %vm772_vm15, nan, %v782_v33  ;;  %v864_v8 = vand.u32 2147483647, %v863_v23  ;;  %v948_v13 = vadd.s32 %v947_v27, %v943_v59  ;;  %v1007_v38 = vsub.s32 32, %v1006_v47 }
 0x12b   : > { %v1005_v32 = vshrl.u32 %v1004_v40, 5  ;;  %v1009_v42 = vshll.u32 %v1754_v37, %v1006_v47  ;;  %v1012_v29 = vshll.u32 %v1755_v39, %v1006_v47  ;;  %v1018_v14 = vshll.u32 %v1757_v43, %v1006_v47  ;;  %1306 = vst [vmem:[%s1903_s4 + $0x10] sm:$0xff] %v783_v12 }
 0x12c   : > { %v867_v56 = vmul.f32 %v866_v26, %v864_v8  ;;  %v949_v2 = vadd.s32 536870912, %v948_v13  ;;  %v1010_v44 = vshrl.u32 %v1755_v39, %v1007_v38  ;;  %v1015_v48 = vshll.u32 %v1756_v41, %v1006_v47 }
 0x12d   : > { %v1013_v10 = vshrl.u32 %v1756_v41, %v1007_v38  ;;  %v1016_v21 = vshrl.u32 %v1757_v43, %v1007_v38  ;;  %v1019_v34 = vshrl.u32 %v1758_v45, %v1007_v38  ;;  %v1021_v58 = vshll.u32 %v1758_v45, %v1006_v47 }
 0x12e   : > { %v868_v5 = vxor.u32 2147483648, %v867_v56  ;;  %v950_v35 = vshrl.u32 %v949_v2, 30  ;;  %v1011_v49 = vor.u32 %v1010_v44, %v1009_v42  ;;  %v1022_v50 = vshrl.u32 %v1759_v52, %v1007_v38 }
 0x12f   : > { %v877_v51 = vadd.s32 3, %v873_v24  ;;  %v1014_v53 = vor.u32 %v1013_v10, %v1012_v29  ;;  %v1020_v54 = vor.u32 %v1019_v34, %v1018_v14  ;;  %vm1024_vm4 = vcmp.lt.s32.totalorder %v1005_v32, 1 }
 0x130   : > { %v869_v6 = vsel %vm786_vm7, %v868_v5, %v867_v56  ;;  %v951_v63 = vshll.u32 %v950_v35, 30  ;;  %v1017_v16 = vor.u32 %v1016_v21, %v1015_v48  ;;  %vm1025_vm5 = vcmp.lt.s32.totalorder %v1005_v32, 2 }
 0x131   : > { %v872_v19 = vsel %vm2361_vm2, %v1998_v25, %v869_v6  ;;  %v1023_v46 = vor.u32 %v1022_v50, %v1021_v58  ;;  %vm1026_vm6 = vcmp.lt.s32.totalorder %v1005_v32, 3  ;;  %vm1027_vm8 = vcmp.lt.s32.totalorder %v1005_v32, 4 }
 0x132   : > { %1599 = vcosq.f32 %v872_v19  ;;  %v2393_v0 = vsub.s32 %v948_v13, %v951_v63  ;;  %v1008_v55 = vshrl.u32 %v1754_v37, %v1007_v38  ;;  %v1032_v17 = vsel %vm1024_vm4, %v1011_v49, %v1014_v53 }
 0x133   : > { %1601 = vsinq.f32 %v872_v19  ;;  %v1029_v60 = vsel %vm1027_vm8, %v1017_v16, 2102212464  ;;  %v1033_v18 = vsel %vm1027_vm8, %v1020_v54, 920167782  ;;  %v1040_v40 = vshll.u32 %v1000_v20, 8 }
 0x134   : > { %v878_v4 = vand.u32 3, %v877_v51  ;;  %v954_v22 = vsub.s32 0, %v2393_v0  ;;  %v1034_v1 = vsel %vm1026_vm6, %v1017_v16, %v1033_v18  ;;  %v974_v59 = vsub.s32 4, %v950_v35 }
 0x135   : > { %v1035_v28 = vsel %vm1025_vm5, %v1032_v17, %v1034_v1  ;;  %v1036_v15 = vsel %vm1024_vm4, %v1014_v53, %v1017_v16  ;;  %v1037_v7 = vsel %vm1027_vm8, %v1023_v46, 1326507024  ;;  %v1028_v23 = vsel %vm1024_vm4, %v1008_v55, %v1011_v49 }
 0x136   : > { %v1432_v30 = vmin.u32 %v954_v22, %v2393_v0  ;;  %v1030_v26 = vsel %vm1026_vm6, %v1014_v53, %v1029_v60  ;;  %v1038_v47 = vsel %vm1026_vm6, %v1020_v54, %v1037_v7  ;;  %vm890_vm7 = vcmp.lt.s32.totalorder %v1976_v61, 0 }
 0x137   : > { %v1039_v33 = vsel %vm1025_vm5, %v1036_v15, %v1038_v47  ;;  %v2406_v24 = vmul.u32.u64.low %v1040_v40, %v1035_v28  ;;  %v2407_v27 = vmul.u32.u64.high %v1040_v40, %v1035_v28, %v2406_v24  ;;  %v1031_v12 = vsel %vm1025_vm5, %v1028_v23, %v1030_v26 }
 0x138   : > { %v956_v20 = vclz %v1432_v30  ;;  %v2411_v8 = vmul.u32.u64.low %v1040_v40, %v1039_v33  ;;  %v2412_v13 = vmul.u32.u64.high %v1040_v40, %v1039_v33, %v2411_v8  ;;  %v1099_v38 = vand.u32 2139095040, %v1980_v62 }
 0x139   : > { %vm879_vm9 = vcmp.lt.s32.totalorder %v878_v4, 2  ;;  %vm2417_vm10 = vcmp.le.f32.partialorder %v888_v31, 0.7853982  ;;  %v975_v14 = vsel %vm890_vm7, %v974_v59, %v950_v35  ;;  %vm880_vm11 = vcmp.eq.s32.totalorder %v878_v4, 0 }
 0x13a   : > { %v1433_v29 = vadd.s32 4294967294, %v956_v20  ;;  %vm883_vm13 = vcmp.eq.s32.totalorder %v878_v4, 2  ;;  %v1050_v32 = vadd.s32 1, %v2407_v27  ;;  %v1100_v56 = vshrl.u32 %v1099_v38, 23 }
 0x13b   : > { %v944_v44 = vadd.s32 %v2348_v11, %v2345_v57  ;;  %v1047_v48 = vmul.u32 %v1040_v40, %v1031_v12  ;;  %v1096_v31 = vand.u32 2147483647, %v1980_v62  ;;  %v977_v58 = vsel %vm2417_vm10, 0, %v975_v14 }
 0x13c   : > { %v1600_v2 = vpop.eup %1599  ;;  %vm1434_vm14 = vcmp.lt.s32.totalorder %v1433_v29, 0  ;;  %vm1049_vm15 = vc.u32 %v2412_v13, %v2406_v24  ;;  %vm876_vm12 = vweird.f32 %v1998_v25  ;;  %v1439_v51 = vadd.s32 4294967169, %v1100_v56 }
 0x13d   : > { %v1602_v10 = vpop.eup %1601  ;;  %v884_v21 = vxor.u32 2147483648, %v1600_v2  ;;  %v959_v34 = vsel %vm1434_vm14, 0, %v1433_v29  ;;  %v1051_v11 = vsel %vm1049_vm15, %v1050_v32, %v2407_v27  ;;  %v981_v19 = vadd.s32 3, %v977_v58 }
 0x13e   : > { %v881_v5 = vxor.u32 2147483648, %v1602_v10  ;;  %v960_v35 = vsub.s32 32, %v959_v34  ;;  %v961_v49 = vshll.u32 %v2393_v0, %v959_v34  ;;  %v964_v50 = vsub.s32 4294967266, %v959_v34 }
 0x13f   : > { %v885_v57 = vsel %vm883_vm13, %v884_v21, %v1602_v10  ;;  %v1052_v63 = vadd.s32 %v1051_v11, %v1047_v48  ;;  %v1103_v46 = vand.u32 8388607, %v1096_v31  ;;  %v1106_v0 = vadd.s32 1, %v1439_v51 }
 0x140   : > { %v882_v53 = vsel %vm880_vm11, %v1600_v2, %v881_v5  ;;  %v962_v54 = vshrl.u32 %v944_v44, %v960_v35  ;;  %v965_v6 = vadd.s32 127, %v964_v50  ;;  %v1200_v18 = vand.u32 2147483647, %v1982_v3 }
 0x141   : > { %v886_v16 = vsel %vm879_vm9, %v882_v53, %v885_v57  ;;  %v1053_v60 = vadd.s32 536870912, %v1052_v63  ;;  %vm1107_vm0 = vcmp.gt.s32.totalorder %v1106_v0, 0  ;;  %v1203_v40 = vand.u32 2139095040, %v1982_v3 }
 0x142   : > { %v887_v55 = vsel %vm876_vm12, nan, %v886_v16  ;;  %v963_v25 = vor.u32 %v962_v54, %v961_v49  ;;  %v966_v17 = vshll.u32 %v965_v6, 23  ;;  %v1108_v4 = vsel %vm1107_vm0, %v1106_v0, 0 }
 0x143   : > { %1307 = vst [vmem:[%s1903_s4 + $0x18] sm:$0xff] %v887_v55  ;;  %v2441_v59 = vshrl.u32 %v1053_v60, 30  ;;  %v1110_v28 = vand.u32 31, %v1108_v4  ;;  %v2443_v7 = vand.u32 3, %v981_v19  ;;  %v1104_v23 = vor.u32 8388608, %v1103_v46 }
 0x144   : > { %v967_v22 = vor.u32 4788187, %v966_v17  ;;  %v970_v1 = vcvt.s32.f32 %v963_v25  ;;  %v1048_v26 = vadd.s32 %v2406_v24, %v2412_v13  ;;  %v1204_v33 = vshrl.u32 %v1203_v40, 23 }
 0x145   : > { %v1055_v30 = vshll.u32 %v2441_v59, 30  ;;  %v1111_v47 = vsub.s32 32, %v1110_v28  ;;  %v2449_v27 = vand.u32 8388607, %v1200_v18  ;;  %v1113_v8 = vshll.u32 %v1754_v37, %v1110_v28 }
 0x146   : > { %v968_v15 = vand.u32 2147483647, %v967_v22  ;;  %v1116_v38 = vshll.u32 %v1755_v39, %v1110_v28  ;;  %v1119_v32 = vshll.u32 %v1756_v41, %v1110_v28  ;;  %v1122_v24 = vshll.u32 %v1757_v43, %v1110_v28 }
 0x147   : > { %v2451_v12 = vsub.s32 %v1052_v63, %v1055_v30  ;;  %v1114_v29 = vshrl.u32 %v1755_v39, %v1111_v47  ;;  %v1117_v14 = vshrl.u32 %v1756_v41, %v1111_v47  ;;  %v1109_v2 = vshrl.u32 %v1108_v4, 5 }
 0x148   : > { %v971_v20 = vmul.f32 %v970_v1, %v968_v15  ;;  %v1120_v44 = vshrl.u32 %v1757_v43, %v1111_v47  ;;  %v1112_v48 = vshrl.u32 %v1754_v37, %v1111_v47  ;;  %v1123_v10 = vshrl.u32 %v1758_v45, %v1111_v47 }
 0x149   : > { %v1058_v56 = vsub.s32 0, %v2451_v12  ;;  %v1125_v21 = vshll.u32 %v1758_v45, %v1110_v28  ;;  %v1443_v34 = vadd.s32 4294967169, %v1204_v33  ;;  %v1115_v35 = vor.u32 %v1114_v29, %v1113_v8 }
 0x14a   : > { %v972_v13 = vxor.u32 2147483648, %v971_v20  ;;  %v1118_v49 = vor.u32 %v1117_v14, %v1116_v38  ;;  %v1121_v57 = vor.u32 %v1120_v44, %v1119_v32  ;;  %v1124_v11 = vor.u32 %v1123_v10, %v1122_v24 }
 0x14b   : > { %v1436_v5 = vmin.u32 %v1058_v56, %v2451_v12  ;;  %v1126_v51 = vshrl.u32 %v1759_v52, %v1111_v47  ;;  %vm1128_vm1 = vcmp.lt.s32.totalorder %v1109_v2, 1  ;;  %v1144_v54 = vshll.u32 %v1104_v23, 8 }
 0x14c   : > { %v973_v58 = vsel %vm890_vm7, %v972_v13, %v971_v20  ;;  %vm1129_vm2 = vcmp.lt.s32.totalorder %v1109_v2, 2  ;;  %v1210_v63 = vadd.s32 1, %v1443_v34  ;;  %vm1130_vm3 = vcmp.lt.s32.totalorder %v1109_v2, 3 }
 0x14d   : > { %v976_v50 = vsel %vm2417_vm10, %v1976_v61, %v973_v58  ;;  %v1060_v53 = vclz %v1436_v5  ;;  %v1127_v6 = vor.u32 %v1126_v51, %v1125_v21  ;;  %vm1131_vm4 = vcmp.lt.s32.totalorder %v1109_v2, 4 }
 0x14e   : > { %1603 = vcosq.f32 %v976_v50  ;;  %v1132_v19 = vsel %vm1128_vm1, %v1112_v48, %v1115_v35  ;;  %v1133_v46 = vsel %vm1131_vm4, %v1121_v57, 2102212464  ;;  %v1136_v0 = vsel %vm1128_vm1, %v1115_v35, %v1118_v49 }
 0x14f   : > { %1605 = vsinq.f32 %v976_v50  ;;  %v1437_v16 = vadd.s32 4294967294, %v1060_v53  ;;  %v1137_v42 = vsel %vm1131_vm4, %v1124_v11, 920167782  ;;  %v1140_v55 = vsel %vm1128_vm1, %v1118_v49, %v1121_v57 }
 0x150   : > { %vm994_vm5 = vcmp.lt.s32.totalorder %v1978_v9, 0  ;;  %v1134_v25 = vsel %vm1130_vm3, %v1118_v49, %v1133_v46  ;;  %v1138_v17 = vsel %vm1130_vm3, %v1121_v57, %v1137_v42  ;;  %v1141_v60 = vsel %vm1131_vm4, %v1127_v6, 1326507024 }
 0x151   : > { %vm1438_vm6 = vcmp.lt.s32.totalorder %v1437_v16, 0  ;;  %vm980_vm8 = vweird.f32 %v1976_v61  ;;  %v1135_v22 = vsel %vm1129_vm2, %v1132_v19, %v1134_v25  ;;  %v1139_v1 = vsel %vm1129_vm2, %v1136_v0, %v1138_v17 }
 0x152   : > { %v1063_v40 = vsel %vm1438_vm6, 0, %v1437_v16  ;;  %v1142_v4 = vsel %vm1130_vm3, %v1124_v11, %v1141_v60  ;;  %v2483_v20 = vmul.u32.u64.low %v1144_v54, %v1139_v1  ;;  %v2484_v8 = vmul.u32.u64.high %v1144_v54, %v1139_v1, %v2483_v20 }
 0x153   : > { %v1064_v28 = vsub.s32 32, %v1063_v40  ;;  %v1065_v15 = vshll.u32 %v2451_v12, %v1063_v40  ;;  %v1068_v30 = vsub.s32 4294967266, %v1063_v40  ;;  %v1143_v23 = vsel %vm1129_vm2, %v1140_v55, %v1142_v4 }
 0x154   : > { %v2480_v47 = vmul.u32.u64.low %v1144_v54, %v1143_v23  ;;  %v2481_v33 = vmul.u32.u64.high %v1144_v54, %v1143_v23, %v2480_v47  ;;  %vm983_vm7 = vcmp.lt.s32.totalorder %v2443_v7, 2  ;;  %vm1211_vm9 = vcmp.gt.s32.totalorder %v1210_v63, 0 }
 0x155   : > { %v1066_v38 = vshrl.u32 %v1048_v26, %v1064_v28  ;;  %v1069_v29 = vadd.s32 127, %v1068_v30  ;;  %vm987_vm10 = vcmp.eq.s32.totalorder %v2443_v7, 2  ;;  %vm2491_vm11 = vcmp.le.f32.partialorder %v992_v36, 0.7853982 }
 0x156   : > { %v1078_v14 = vsub.s32 4, %v2441_v59  ;;  %v1208_v32 = vor.u32 8388608, %v2449_v27  ;;  %v1212_v24 = vsel %vm1211_vm9, %v1210_v63, 0  ;;  %v1151_v44 = vmul.u32 %v1144_v54, %v1135_v22 }
 0x157   : > { %v1067_v56 = vor.u32 %v1066_v38, %v1065_v15  ;;  %v1070_v2 = vshll.u32 %v1069_v29, 23  ;;  %v1214_v26 = vand.u32 31, %v1212_v24  ;;  %vm984_vm13 = vcmp.eq.s32.totalorder %v2443_v7, 0 }
 0x158   : > { %v1604_v13 = vpop.eup %1603  ;;  %vm1153_vm14 = vc.u32 %v2481_v33, %v2483_v20  ;;  %v1154_v36 = vadd.s32 1, %v2484_v8  ;;  %v1079_v35 = vsel %vm994_vm5, %v1078_v14, %v2441_v59  ;;  %v2507_v50 = vshll.u32 %v1208_v32, 8 }
 0x159   : > { %v1606_v48 = vpop.eup %1605  ;;  %v988_v10 = vxor.u32 2147483648, %v1604_v13  ;;  %v1071_v34 = vor.u32 4788187, %v1070_v2  ;;  %v1074_v58 = vcvt.s32.f32 %v1067_v56  ;;  %v1215_v5 = vsub.s32 32, %v1214_v26 }
 0x15a   : > { %v985_v21 = vxor.u32 2147483648, %v1606_v48  ;;  %v1155_v49 = vsel %vm1153_vm14, %v1154_v36, %v2484_v8  ;;  %v1217_v53 = vshll.u32 %v1754_v37, %v1214_v26  ;;  %v1220_v63 = vshll.u32 %v1755_v39, %v1214_v26 }
 0x15b   : > { %v989_v27 = vsel %vm987_vm10, %v988_v10, %v1606_v48  ;;  %v1072_v11 = vand.u32 2147483647, %v1071_v34  ;;  %v1156_v51 = vadd.s32 %v1155_v49, %v1151_v44  ;;  %v1218_v6 = vshrl.u32 %v1755_v39, %v1215_v5 }
 0x15c   : > { %v986_v57 = vsel %vm984_vm13, %v1604_v13, %v985_v21  ;;  %v1221_v16 = vshrl.u32 %v1756_v41, %v1215_v5  ;;  %v1213_v0 = vshrl.u32 %v1212_v24, 5  ;;  %v1223_v42 = vshll.u32 %v1756_v41, %v1214_v26 }
 0x15d   : > { %v990_v54 = vsel %vm983_vm7, %v986_v57, %v989_v27  ;;  %v1075_v19 = vmul.f32 %v1074_v58, %v1072_v11  ;;  %v1157_v46 = vadd.s32 536870912, %v1156_v51  ;;  %v1224_v55 = vshrl.u32 %v1757_v43, %v1215_v5 }
 0x15e   : > { %v991_v59 = vsel %vm980_vm8, nan, %v990_v54  ;;  %v1226_v25 = vshll.u32 %v1757_v43, %v1214_v26  ;;  %v1227_v7 = vshrl.u32 %v1758_v45, %v1215_v5  ;;  %v1081_v39 = vsel %vm2491_vm11, 0, %v1079_v35 }
 0x15f   : > { %1308 = vst [vmem:[%s1903_s4 + $0x20] sm:$0xff] %v991_v59  ;;  %v1076_v17 = vxor.u32 2147483648, %v1075_v19  ;;  %v2524_v60 = vshrl.u32 %v1157_v46, 30  ;;  %v1229_v61 = vshll.u32 %v1758_v45, %v1214_v26  ;;  %v1216_v40 = vshrl.u32 %v1754_v37, %v1215_v5 }
 0x160   : > { %v1219_v22 = vor.u32 %v1218_v6, %v1217_v53  ;;  %v1222_v1 = vor.u32 %v1221_v16, %v1220_v63  ;;  %v1230_v41 = vshrl.u32 %v1759_v52, %v1215_v5  ;;  %v1228_v28 = vor.u32 %v1227_v7, %v1226_v25 }
 0x161   : > { %v1077_v43 = vsel %vm994_vm5, %v1076_v17, %v1075_v19  ;;  %v1159_v4 = vshll.u32 %v2524_v60, 30  ;;  %vm1232_vm15 = vcmp.lt.s32.totalorder %v1213_v0, 1  ;;  %v1225_v30 = vor.u32 %v1224_v55, %v1223_v42 }
 0x162   : > { %v1080_v15 = vsel %vm2491_vm11, %v1978_v9, %v1077_v43  ;;  %v1231_v23 = vor.u32 %v1230_v41, %v1229_v61  ;;  %vm1235_vm12 = vcmp.lt.s32.totalorder %v1213_v0, 4  ;;  %v1085_v37 = vadd.s32 3, %v1081_v39 }
 0x163   : > { %1607 = vcosq.f32 %v1080_v15  ;;  %v1160_v45 = vsub.s32 %v1156_v51, %v1159_v4  ;;  %vm1234_vm0 = vcmp.lt.s32.totalorder %v1213_v0, 3  ;;  %vm1233_vm1 = vcmp.lt.s32.totalorder %v1213_v0, 2 }
 0x164   : > { %1609 = vsinq.f32 %v1080_v15  ;;  %v1237_v52 = vsel %vm1235_vm12, %v1225_v30, 2102212464  ;;  %v1240_v47 = vsel %vm1232_vm15, %v1219_v22, %v1222_v1  ;;  %v1241_v38 = vsel %vm1235_vm12, %v1228_v28, 920167782 }
 0x165   : > { %v1162_v8 = vsub.s32 0, %v1160_v45  ;;  %v1236_v29 = vsel %vm1232_vm15, %v1216_v40, %v1219_v22  ;;  %v1242_v14 = vsel %vm1234_vm0, %v1225_v30, %v1241_v38  ;;  %v1244_v12 = vsel %vm1232_vm15, %v1222_v1, %v1225_v30 }
 0x166   : > { %v1245_v32 = vsel %vm1235_vm12, %v1231_v23, 1326507024  ;;  %v1238_v13 = vsel %vm1234_vm0, %v1222_v1, %v1237_v52  ;;  %v1243_v56 = vsel %vm1233_vm1, %v1240_v47, %v1242_v14  ;;  %v1086_v44 = vand.u32 3, %v1085_v37 }
 0x167   : > { %v1440_v24 = vmin.u32 %v1162_v8, %v1160_v45  ;;  %v1246_v2 = vsel %vm1234_vm0, %v1228_v28, %v1245_v32  ;;  %v2541_v48 = vmul.u32.u64.low %v2507_v50, %v1243_v56  ;;  %v2542_v10 = vmul.u32.u64.high %v2507_v50, %v1243_v56, %v2541_v48 }
 0x168   : > { %v1247_v26 = vsel %vm1233_vm1, %v1244_v12, %v1246_v2  ;;  %v1239_v21 = vsel %vm1233_vm1, %v1236_v29, %v1238_v13  ;;  %vm1087_vm2 = vcmp.lt.s32.totalorder %v1086_v44, 2  ;;  %vm1091_vm3 = vcmp.eq.s32.totalorder %v1086_v44, 2 }
 0x169   : > { %v1164_v36 = vclz %v1440_v24  ;;  %v2546_v34 = vmul.u32.u64.low %v2507_v50, %v1247_v26  ;;  %v2547_v58 = vmul.u32.u64.high %v2507_v50, %v1247_v26, %v2546_v34  ;;  %v1258_v27 = vadd.s32 1, %v2542_v10 }
 0x16a   : > { %v1152_v49 = vadd.s32 %v2483_v20, %v2481_v33  ;;  %v1255_v57 = vmul.u32 %v2507_v50, %v1239_v21  ;;  %vm1088_vm5 = vcmp.eq.s32.totalorder %v1086_v44, 0  ;;  %vm1084_vm8 = vweird.f32 %v1978_v9 }
 0x16b   : > { %v1441_v5 = vadd.s32 4294967294, %v1164_v36  ;;  %vm1257_vm6 = vc.u32 %v2547_v58, %v2541_v48  ;;  %v1182_v9 = vsub.s32 4, %v2524_v60  ;;  %vm1098_vm7 = vcmp.lt.s32.totalorder %v1980_v62, 0 }
 0x16c   : > { %v1259_v19 = vsel %vm1257_vm6, %v1258_v27, %v2542_v10  ;;  %vm1097_vm9 = vcmp.le.f32.partialorder %v1096_v31, 0.7853982  ;;  %v1256_v8 = vadd.s32 %v2541_v48, %v2547_v58  ;;  %vm1188_vm15 = vweird.f32 %v1980_v62 }
 0x16d   : > { %v1608_v35 = vpop.eup %1607  ;;  %vm1442_vm4 = vcmp.lt.s32.totalorder %v1441_v5, 0  ;;  %v1260_v50 = vadd.s32 %v1259_v19, %v1255_v57  ;;  %v1183_v4 = vsel %vm1098_vm7, %v1182_v9, %v2524_v60  ;;  %vm1202_vm12 = vcmp.lt.s32.totalorder %v1982_v3, 0 }
 0x16e   : > { %v1610_v11 = vpop.eup %1609  ;;  %v1092_v51 = vxor.u32 2147483648, %v1608_v35  ;;  %v1167_v53 = vsel %vm1442_vm4, 0, %v1441_v5  ;;  %v1185_v37 = vsel %vm1097_vm9, 0, %v1183_v4  ;;  %vm1201_vm0 = vcmp.le.f32.partialorder %v1200_v18, 0.7853982 }
 0x16f   : > { %v1089_v54 = vxor.u32 2147483648, %v1610_v11  ;;  %v1168_v6 = vsub.s32 32, %v1167_v53  ;;  %v1169_v63 = vshll.u32 %v1160_v45, %v1167_v53  ;;  %v1172_v16 = vsub.s32 4294967266, %v1167_v53 }
 0x170   : > { %v1093_v59 = vsel %vm1091_vm3, %v1092_v51, %v1610_v11  ;;  %v1261_v7 = vadd.s32 536870912, %v1260_v50  ;;  %v1189_v52 = vadd.s32 3, %v1185_v37  ;;  %vm1292_vm4 = vweird.f32 %v1982_v3 }
 0x171   : > { %v1090_v33 = vsel %vm1088_vm5, %v1608_v35, %v1089_v54  ;;  %v1170_v20 = vshrl.u32 %v1152_v49, %v1168_v6  ;;  %v1173_v46 = vadd.s32 127, %v1172_v16 }
 0x172   : > { %v1094_v0 = vsel %vm1087_vm2, %v1090_v33, %v1093_v59  ;;  %v1262_v61 = vshrl.u32 %v1261_v7, 30  ;;  %v1190_v29 = vand.u32 3, %v1189_v52 }
 0x173   : > { %v1095_v42 = vsel %vm1084_vm8, nan, %v1094_v0  ;;  %v1171_v55 = vor.u32 %v1170_v20, %v1169_v63  ;;  %v1174_v25 = vshll.u32 %v1173_v46, 23 }
 0x174   : > { %1309 = vst [vmem:[%s1903_s4 + $0x28] sm:$0xff] %v1095_v42  ;;  %v1263_v22 = vshll.u32 %v1262_v61, 30  ;;  %vm1195_vm11 = vcmp.eq.s32.totalorder %v1190_v29, 2  ;;  %vm1192_vm13 = vcmp.eq.s32.totalorder %v1190_v29, 0  ;;  %vm1191_vm14 = vcmp.lt.s32.totalorder %v1190_v29, 2 }
 0x175   : > { %v1175_v17 = vor.u32 4788187, %v1174_v25  ;;  %v1178_v39 = vcvt.s32.f32 %v1171_v55  ;;  %v1286_v58 = vsub.s32 4, %v1262_v61 }
 0x176   : > { %v1264_v41 = vsub.s32 %v1260_v50, %v1263_v22 }
 0x177   : > { %v1176_v40 = vand.u32 2147483647, %v1175_v17  ;;  %v1287_v57 = vsel %vm1202_vm12, %v1286_v58, %v1262_v61 }
 0x178   : > { %v1266_v28 = vsub.s32 0, %v1264_v41  ;;  %v1289_v53 = vsel %vm1201_vm0, 0, %v1287_v57 }
 0x179   : > { %v1179_v1 = vmul.f32 %v1178_v39, %v1176_v40 }
 0x17a   : > { %v1444_v30 = vmin.u32 %v1266_v28, %v1264_v41 }
 0x17b   : > { %v1180_v43 = vxor.u32 2147483648, %v1179_v1 }
 0x17c   : > { %v1268_v45 = vclz %v1444_v30 }
 0x17d   : > { %v1181_v15 = vsel %vm1098_vm7, %v1180_v43, %v1179_v1 }
 0x17e   : > { %v1184_v23 = vsel %vm1097_vm9, %v1980_v62, %v1181_v15  ;;  %v1445_v47 = vadd.s32 4294967294, %v1268_v45  ;;  %v1293_v62 = vadd.s32 3, %v1289_v53 }
 0x17f   : > { %1611 = vcosq.f32 %v1184_v23 }
 0x180   : > { %1613 = vsinq.f32 %v1184_v23  ;;  %vm1446_vm10 = vcmp.lt.s32.totalorder %v1445_v47, 0  ;;  %v1294_v54 = vand.u32 3, %v1293_v62 }
 0x181   : > { %v1271_v38 = vsel %vm1446_vm10, 0, %v1445_v47 }
 0x182   : > { %v1272_v31 = vsub.s32 32, %v1271_v38  ;;  %v1273_v14 = vshll.u32 %v1264_v41, %v1271_v38  ;;  %v1276_v12 = vsub.s32 4294967266, %v1271_v38  ;;  %vm1299_vm1 = vcmp.eq.s32.totalorder %v1294_v54, 2 }
 0x183   : > { %vm1296_vm2 = vcmp.eq.s32.totalorder %v1294_v54, 0  ;;  %vm1295_vm3 = vcmp.lt.s32.totalorder %v1294_v54, 2 }
 0x184   : > { %v1274_v60 = vshrl.u32 %v1256_v8, %v1272_v31  ;;  %v1277_v32 = vadd.s32 127, %v1276_v12 }
 0x186   : > { %v1275_v13 = vor.u32 %v1274_v60, %v1273_v14  ;;  %v1278_v56 = vshll.u32 %v1277_v32, 23 }
 0x188   : > { %v1279_v10 = vor.u32 4788187, %v1278_v56  ;;  %v1282_v48 = vcvt.s32.f32 %v1275_v13 }
 0x189   : > { %v1612_v24 = vpop.eup %1611 }
 0x18a   : > { %v1614_v2 = vpop.eup %1613  ;;  %v1196_v44 = vxor.u32 2147483648, %v1612_v24  ;;  %v1280_v34 = vand.u32 2147483647, %v1279_v10 }
 0x18b   : > { %v1193_v26 = vxor.u32 2147483648, %v1614_v2 }
 0x18c   : > { %v1197_v36 = vsel %vm1195_vm11, %v1196_v44, %v1614_v2  ;;  %v1283_v35 = vmul.f32 %v1282_v48, %v1280_v34 }
 0x18d   : > { %v1194_v21 = vsel %vm1192_vm13, %v1612_v24, %v1193_v26 }
 0x18e   : > { %v1198_v5 = vsel %vm1191_vm14, %v1194_v21, %v1197_v36  ;;  %v1284_v49 = vxor.u32 2147483648, %v1283_v35 }
 0x18f   : > { %v1199_v27 = vsel %vm1188_vm15, nan, %v1198_v5 }
 0x190   : > { %1310 = vst [vmem:[%s1903_s4 + $0x30] sm:$0xff] %v1199_v27  ;;  %v1285_v11 = vsel %vm1202_vm12, %v1284_v49, %v1283_v35 }
 0x191   : > { %v1288_v51 = vsel %vm1201_vm0, %v1982_v3, %v1285_v11 }
 0x192   : > { %1615 = vcosq.f32 %v1288_v51 }
 0x193   : > { %1617 = vsinq.f32 %v1288_v51 }
 0x19c   : > { %v1616_v6 = vpop.eup %1615 }
 0x19d   : > { %v1618_v63 = vpop.eup %1617  ;;  %v1300_v16 = vxor.u32 2147483648, %v1616_v6 }
 0x19e   : > { %v1297_v59 = vxor.u32 2147483648, %v1618_v63 }
 0x19f   : > { %v1301_v18 = vsel %vm1299_vm1, %v1300_v16, %v1618_v63 }
 0x1a0   : > { %v1298_v19 = vsel %vm1296_vm2, %v1616_v6, %v1297_v59 }
 0x1a1   : > { %v1302_v33 = vsel %vm1295_vm3, %v1298_v19, %v1301_v18 }
 0x1a2   : > { %v1303_v20 = vsel %vm1292_vm4, nan, %v1302_v33 }
 0x1a3   : > { %1311 = vst [vmem:[%s1903_s4 + $0x38] sm:$0xff] %v1303_v20 }
 0x1a4 PF: > { %s1448_s18 = sshll.u32 %s1729_s9, 3  ;;  %s1449_s19 = sshll.u32 %s1733_s10, 4 }
 0x1a5   : > { %s1329_s22 = sshll.u32 %s1903_s4, 4  ;;  %s1325_s27 = sadd.s32 %s1449_s19, %s1448_s18  ;;  %s2576_s22 = int_to_ptr.vmem [resolvable:$true] %s1329_s22 }
 0x1a6   : > { %s1450_s28 = sshll.u32 %s1325_s27, 7  ;;  %s1313_s2 = scalar_lea.sflag [#allocation4], %s119_s23 }
 0x1a7   : > { %s1327_s30 = scalar_lea.hbm %s2628_s1, %s1450_s28  ;;  %s1647_s25 = scalar_lea.vmem %s2576_s22, 1024 }
 0x1a8   : > { %p1648_p12 = scmp.ne.s32.totalorder %s2576_s22, %s1647_s25  ;;  %p2653_p0 = scmp.ne.s32.totalorder %s2633_s20, 0 }
 0x1a9   : > { %s1760_s9 = smov [#allocation5]  }
 0x1aa   : > { %p1649_p2 = pnand %p1648_p12, %p2653_p0  ;;  %s1651_s10 = sshll.u32 %s1760_s9, 4  ;;  %s1652_s10 = int_to_ptr.vmem [resolvable:$false] %s1651_s10 }
 0x1ab   : > { %s1653_s3 = scalar_lea.vmem %s1652_s10, 2048  ;;  %p1654_p6 = scmp.lt.s32.totalorder %s2576_s22, %s1652_s10 }
 0x1ac   : > { %p1650_p5 = pneg %p1649_p2  ;;  %p1655_p7 = scmp.lt.s32.totalorder %s1653_s3, %s1647_s25 }
 0x1ae   : > { %p1656_p9 = por %p1655_p7, %p1654_p6 }
 0x1b0   : > { %p1657_p11 = pnand %p1656_p9, %p1650_p5 }
 0x1b2   : > { %1660 = shalt.err (!%p1657_p11)
}
 0x1b3   : > { %s1661_s4 = scalar_lea.hbm %s1327_s30, 1024  ;;  %s1665_s14 = scalar_lea.hbm %s2628_s1, 4096 }
 0x1b4   : > { %p1662_p13 = scmp.ne.s32.totalorder %s1327_s30, %s1661_s4  ;;  %p1666_p3 = scmp.lt.u32.totalorder %s1327_s30, %s2628_s1 }
 0x1b5   : > { %p1667_p8 = scmp.lt.u32.totalorder %s1665_s14, %s1661_s4  ;;  %p1669_p12 = scmp.lt.u32.totalorder %s1661_s4, %s1327_s30 }
 0x1b6   : > { %p1663_p1 = pnand %p1662_p13, %p2653_p0 }
 0x1b7   : > { %p1668_p10 = por %p1667_p8, %p1666_p3 }
 0x1b8   : > { %p1664_p4 = pneg %p1663_p1 }
 0x1b9   : > { %p1670_p2 = por %p1669_p12, %p1668_p10 }
 0x1bb   : > { %p1671_p5 = pnand %p1670_p2, %p1664_p4 }
 0x1bd   : > { %1674 = shalt.err (!%p1671_p5)
}
 0x1be   : > { %1493 = dma.vmem_to_hbm [thread:$0]  (%p2653_p0), %s2576_s22, 1024, %s1327_s30, %s1313_s2  }
 0x1bf PF: > { %p1505_p6 = scmp.ge.s32.totalorder %s1745_s13, 2  ;;  %s1341_s19 = sand.u32 1, %s1717_s6  }
 0x1c0   : > { %p2654_p7 = scmp.ne.s32.totalorder %s2634_s21, 0  ;;  %s1342_s27 = scalar_lea.sflag [#allocation4], %s1341_s19 }
 0x1c2   : > { %p1500_p9 = pnand %p1505_p6, %p2654_p7 }
 0x1c4   : > { %1712 = dma.done.wait (!%p1500_p9), %s1342_s27, 1024  }
 0x1c5   : > { %1714 = vsyncadd (!%p1500_p9), %s1342_s27, 4294966272  ;;  %s15_s13 = sadd.s32 1, %s1745_s13   ;;  %s2655_s6 = smov %s1721_s7 }
 0x1c6   : > { %p12_p11 = scmp.ge.s32.totalorder %s15_s13, 6   ;;  %s2656_s7 = smov %s1725_s8 }
 0x1c7   : > { %s2657_s8 = smov %s1850_s26  ;;  %s2658_s9 = smov %s1737_s11 }
 0x1c8   : > { %s2659_s10 = smov %s1741_s12  ;;  %s2660_s11 = smov %s2663_s16 }
 0x1c9   : > { %s2661_s12 = smov %s2667_s17  ;;  %14 = sbr.rel (!%p12_p11) target bundleno = 6 (0x6), region = 71 }
 0x1d0   :  { %1347 = vsyncpa [#allocation3], 1 }
 0x1d1   :  { %1349 = vsyncpa [#allocation3 + $0x1], 1 }
 0x1d2   :  { %1350 = vsyncpa [#allocation4], 1 }
 0x1d3   :  { %1352 = vsyncpa [#allocation4 + $0x1], 1 }

</bundles_post_ra>
